<compile_context>
chip_gen: v7x
topology: tpu7x:2x2x1
jax: 0.10.0
libtpu: 0.0.40
codegen_flags: <defaults>
</compile_context>

<pallas_src>
import jax
import jax.numpy as jnp
from jax import lax
from jax.experimental import pallas as pl
from jax.experimental.pallas import tpu as pltpu

MXU_INPUT_DTYPE = jnp.float32          # flip to jnp.bfloat16 for v6e/v7x MXU path
VMEM_LIMIT_BYTES = 48 * 1024 * 1024    # explicit; leaves headroom on v7x (64 MiB)
BN_EPS = 1e-5


# ----------------------------- helpers --------------------------------------

def _round_up(x, m):
    return (x + m - 1) // m * m


def _pick_tile_m(m, bytes_per_col, budget=40 * 1024 * 1024):
    """Largest lane tile (multiple of 128) whose double-buffered blocks fit."""
    for t in (512, 256):
        if m >= t and 2 * t * bytes_per_col <= budget:
            return t
    return 128


# ----------------------------- Pallas kernels -------------------------------

def _maxpool_kernel(x_ref, o_ref):
    # x_ref: (8, C, tile_M) -- 8 taps of each 2x2x2 window; reduce over taps.
    o_ref[...] = jnp.max(x_ref[...], axis=0)


def _conv_stats_kernel(w_ref, p_ref, z_ref, stat_ref):
    # z = W (Co, Kp) @ P (Kp, tile_M), f32 accumulation on the MXU.
    z = jnp.dot(w_ref[...], p_ref[...], preferred_element_type=jnp.float32)
    z_ref[...] = z
    # Per-tile partial BN statistics: lane 0 = sum_m z, lane 1 = sum_m z^2.
    s1 = jnp.sum(z, axis=1, keepdims=True)          # (Co, 1)
    s2 = jnp.sum(z * z, axis=1, keepdims=True)      # (Co, 1)
    lane = lax.broadcasted_iota(jnp.int32, (z.shape[0], 128), 1)
    stat_ref[...] = jnp.where(lane == 0, s1, 0.0) + jnp.where(lane == 1, s2, 0.0)


def _bn_relu_kernel(z_ref, scale_ref, shift_ref, o_ref):
    # Per-channel affine (precomputed from global batch stats) + ReLU.
    o_ref[...] = jnp.maximum(z_ref[...] * scale_ref[...] + shift_ref[...], 0.0)


# ----------------------------- kernel wrappers -------------------------------

def maxpool_2x2x2(windows):
    # windows: (8, C, M) float32, taps of each 2x2x2 window on the lane axis.
    _, C, M = windows.shape
    tm = _pick_tile_m(M, 4 * 9 * C)
    Mp = _round_up(M, tm)
    if Mp != M:
        windows = jnp.pad(windows, ((0, 0), (0, 0), (0, Mp - M)))
    nt = Mp // tm
    out = pl.pallas_call(
        _maxpool_kernel,
        out_shape=jax.ShapeDtypeStruct((C, Mp), jnp.float32),
        grid=(nt,),
        in_specs=[pl.BlockSpec((8, C, tm), lambda i: (0, 0, i))],
        out_specs=pl.BlockSpec((C, tm), lambda i: (0, i)),
        compiler_params=pltpu.CompilerParams(
            dimension_semantics=("parallel",),
            vmem_limit_bytes=VMEM_LIMIT_BYTES),
        cost_estimate=pl.CostEstimate(
            flops=7 * C * Mp, transcendentals=0,
            bytes_accessed=int(9 * C * Mp * 4)),
    )(windows)
    return out[:, :M]


def _im2col_3x3x3_cm(x_cm):
    # x_cm: (C, N, D, H, W) -> (27*C, N*D*H*W), K ordered as (kd, kh, kw, cin).
    C, N, D, H, W = x_cm.shape
    xp = jnp.pad(x_cm, ((0, 0), (0, 0), (1, 1), (1, 1), (1, 1)))
    taps = []
    for kd in range(3):
        for kh in range(3):
            for kw in range(3):
                taps.append(xp[:, :, kd:kd + D, kh:kh + H, kw:kw + W])
    pat = jnp.stack(taps, axis=0)                    # (27, C, N, D, H, W)
    return pat.reshape(27 * C, N * D * H * W)


def conv_bn_relu(x_cm, w_t, gamma, beta, eps=BN_EPS):
    """Conv3d(3x3x3, pad=1) + BatchNorm3d (train-mode batch stats) + ReLU.

    x_cm: (Cin, N, D, H, W) channels-major activation.
    w_t : (Cout, 27*Cin)    channels-major conv weight, K ordered (kd,kh,kw,cin).
          (The conv bias cancels exactly under train-mode BN and is omitted.)
    Returns (Cout, N, D, H, W) float32.
    """
    Cin, N, D, H, W = x_cm.shape
    Cout, K = w_t.shape
    M = N * D * H * W

    patches = _im2col_3x3x3_cm(x_cm)                 # (K, M)

    Co = _round_up(Cout, 8)
    Kp = _round_up(K, 8)
    tm = _pick_tile_m(M, 4 * (Kp + Co))
    Mp = _round_up(M, tm)
    nt = Mp // tm

    if (Kp, Mp) != (K, M):
        patches = jnp.pad(patches, ((0, Kp - K), (0, Mp - M)))
    if (Co, Kp) != (Cout, K):
        w_t = jnp.pad(w_t, ((0, Co - Cout), (0, Kp - K)))
    patches = patches.astype(MXU_INPUT_DTYPE)
    w_t = w_t.astype(MXU_INPUT_DTYPE)

    itm = jnp.dtype(MXU_INPUT_DTYPE).itemsize
    bytes_io = (Co * Kp + Kp * Mp) * itm + (Co * Mp + nt * Co * 128) * 4

    z, stats = pl.pallas_call(
        _conv_stats_kernel,
        out_shape=(jax.ShapeDtypeStruct((Co, Mp), jnp.float32),
                   jax.ShapeDtypeStruct((nt * Co, 128), jnp.float32)),
        grid=(nt,),
        in_specs=[pl.BlockSpec((Co, Kp), lambda i: (0, 0)),   # weight resident
                  pl.BlockSpec((Kp, tm), lambda i: (0, i))],  # patch tile
        out_specs=(pl.BlockSpec((Co, tm), lambda i: (0, i)),  # pre-BN conv out
                   pl.BlockSpec((Co, 128), lambda i: (i, 0))),  # per-tile stats
        compiler_params=pltpu.CompilerParams(
            dimension_semantics=("parallel",),
            vmem_limit_bytes=VMEM_LIMIT_BYTES),
        cost_estimate=pl.CostEstimate(
            flops=2 * Co * Kp * Mp, transcendentals=0,
            bytes_accessed=int(bytes_io)),
    )(w_t, patches)

    # Finalize BN batch statistics over the true M (biased variance, as PyTorch
    # train()-mode).  Padded M columns / Cout rows contribute exactly zero.
    stats = stats.reshape(nt, Co, 128)
    mean = jnp.sum(stats[:, :, 0], axis=0) / M
    var = jnp.maximum(jnp.sum(stats[:, :, 1], axis=0) / M - mean * mean, 0.0)
    g = jnp.pad(gamma, (0, Co - Cout)) if Co != Cout else gamma
    b = jnp.pad(beta, (0, Co - Cout)) if Co != Cout else beta
    scale = (g * lax.rsqrt(var + eps)).astype(jnp.float32)
    shift = (b - mean * scale).astype(jnp.float32)

    y = pl.pallas_call(
        _bn_relu_kernel,
        out_shape=jax.ShapeDtypeStruct((Co, Mp), jnp.float32),
        grid=(nt,),
        in_specs=[pl.BlockSpec((Co, tm), lambda i: (0, i)),
                  pl.BlockSpec((Co, 1), lambda i: (0, 0)),
                  pl.BlockSpec((Co, 1), lambda i: (0, 0))],
        out_specs=pl.BlockSpec((Co, tm), lambda i: (0, i)),
        compiler_params=pltpu.CompilerParams(
            dimension_semantics=("parallel",),
            vmem_limit_bytes=VMEM_LIMIT_BYTES),
        cost_estimate=pl.CostEstimate(
            flops=3 * Co * Mp, transcendentals=0,
            bytes_accessed=int(2 * Co * Mp * 4)),
    )(z, scale.reshape(Co, 1), shift.reshape(Co, 1))

    return y[:Cout, :M].reshape(Cout, N, D, H, W)


# --------------------------------- glue --------------------------------------

def _rearrange_conv_weight(w):
    # PyTorch Conv3d weight (Cout, Cin, 3,3,3) -> (Cout, 27*Cin), K=(kd,kh,kw,cin)
    return jnp.transpose(w, (0, 2, 3, 4, 1)).reshape(w.shape[0], -1)


def down_forward(x_ncdhw, params):
    N, Cin, D, H, W = x_ncdhw.shape
    Dp, Hp, Wp = D // 2, H // 2, W // 2
    M = N * Dp * Hp * Wp

    # NCDHW -> channels-major (C, N, D, H, W): channels on sublanes, flattened
    # spatial positions on lanes for every kernel below.
    x_cm = jnp.transpose(x_ncdhw, (1, 0, 2, 3, 4))

    # MaxPool3d(2): gather the 8 taps of each 2x2x2 window on the lane axis.
    xw = x_cm.reshape(Cin, N, Dp, 2, Hp, 2, Wp, 2)
    xw = jnp.transpose(xw, (3, 5, 7, 0, 1, 2, 4, 6)).reshape(8, Cin, M)
    pooled = maxpool_2x2x2(xw).reshape(Cin, N, Dp, Hp, Wp)

    # DoubleConv: (Conv3d + BN3d + ReLU) x 2.  (conv bias cancels in train-BN)
    y1 = conv_bn_relu(pooled, _rearrange_conv_weight(params["w1"]),
                      params["g1"], params["beta1"])
    y2 = conv_bn_relu(y1, _rearrange_conv_weight(params["w2"]),
                      params["g2"], params["beta2"])

    # channels-major -> NCDHW
    return jnp.transpose(y2, (1, 0, 2, 3, 4))


def init_params(key, in_channels, out_channels, mid_channels=None):
    mid = mid_channels or out_channels
    k = jax.random.split(key, 8)
    return {
        "w1": 0.1 * jax.random.normal(k[0], (mid, in_channels, 3, 3, 3), jnp.float32),
        "b1": 0.05 * jax.random.normal(k[1], (mid,), jnp.float32),
        "g1": 1.0 + 0.1 * jax.random.normal(k[2], (mid,), jnp.float32),
        "beta1": 0.1 * jax.random.normal(k[3], (mid,), jnp.float32),
        "w2": 0.1 * jax.random.normal(k[4], (out_channels, mid, 3, 3, 3), jnp.float32),
        "b2": 0.05 * jax.random.normal(k[5], (out_channels,), jnp.float32),
        "g2": 1.0 + 0.1 * jax.random.normal(k[6], (out_channels,), jnp.float32),
        "beta2": 0.1 * jax.random.normal(k[7], (out_channels,), jnp.float32),
    }


# --------------------------- pure-JAX reference -------------------------------

def reference_forward(x, params):
    def conv_bn_relu_ref(inp, w, b, g, be):
        y = lax.conv_general_dilated(
            inp, w, window_strides=(1, 1, 1),
            padding=((1, 1), (1, 1), (1, 1)),
            dimension_numbers=("NCDHW", "OIDHW", "NCDHW"),
            precision=lax.Precision.HIGHEST)
        y = y + b.reshape(1, -1, 1, 1, 1)
        mu = jnp.mean(y, axis=(0, 2, 3, 4), keepdims=True)
        var = jnp.mean(jnp.square(y - mu), axis=(0, 2, 3, 4), keepdims=True)
        y = (y - mu) * lax.rsqrt(var + BN_EPS)
        y = y * g.reshape(1, -1, 1, 1, 1) + be.reshape(1, -1, 1, 1, 1)
        return jnp.maximum(y, 0.0)

    N, C, D, H, W = x.shape
    p = x.reshape(N, C, D // 2, 2, H // 2, 2, W // 2, 2).max(axis=(3, 5, 7))
    y1 = conv_bn_relu_ref(p, params["w1"], params["b1"], params["g1"], params["beta1"])
    y2 = conv_bn_relu_ref(y1, params["w2"], params["b2"], params["g2"], params["beta2"])
    return y2


# ----------------------------------- main -------------------------------------

if __name__ == "__main__":
    key = jax.random.PRNGKey(0)
    kx, kp = jax.random.split(key)

    N, Cin, Cout = 2, 4, 8
    D = H = W = 16                       # pooled to 8x8x8 -> M = 1024 -> 2 tiles
    x = jax.random.normal(kx, (N, Cin, D, H, W), jnp.float32)   # NCDHW
    params = init_params(kp, Cin, Cout)

    out = jax.block_until_ready(jax.jit(down_forward)(x, params))
    assert out.shape == (N, Cout, D // 2, H // 2, W // 2), out.shape
    assert bool(jnp.all(jnp.isfinite(out)))

    ref = jax.block_until_ready(reference_forward(x, params))
    err = float(jnp.max(jnp.abs(out - ref)))
    assert err < 1e-2, f"max |pallas - reference| = {err}"

    print("KERNEL_OK")
</pallas_src>

<mosaic_0001>
module attributes {stable_mosaic.version = 11 : i64} {
  func.func @_maxpool_kernel(%arg0: i32, %arg1: memref<8x4x512xf32, #tpu.memory_space<vmem>>, %arg2: memref<4x512xf32, #tpu.memory_space<vmem>>) attributes {dimension_semantics = [#tpu.dimension_semantics<parallel>], iteration_bounds = array<i64: 2>, scalar_prefetch = 0 : i64, scratch_operands = 0 : i64, tpu.core_type = #tpu.core_type<tc>, window_params = [{transform_indices = @transform_0, window_bounds = array<i64: 8, 4, 512>}, {transform_indices = @transform_1, window_bounds = array<i64: 4, 512>}]} {
    %c0 = arith.constant 0 : index
    %c0_0 = arith.constant 0 : index
    %c0_1 = arith.constant 0 : index
    %0 = vector.load %arg1[%c0, %c0_0, %c0_1] : memref<8x4x512xf32, #tpu.memory_space<vmem>>, vector<8x4x512xf32>
    %cst = arith.constant dense<0xFF800000> : vector<4x512xf32>
    %1 = vector.multi_reduction <maximumf>, %0, %cst [0] : vector<8x4x512xf32> to vector<4x512xf32>
    %c0_2 = arith.constant 0 : index
    %c0_3 = arith.constant 0 : index
    %2 = vector.load %arg2[%c0_2, %c0_3] : memref<4x512xf32, #tpu.memory_space<vmem>>, vector<4x512xf32>
    tpu.vector_store %arg2[%c0_2, %c0_3], %1 {strides = array<i32>} : memref<4x512xf32, #tpu.memory_space<vmem>>, vector<4x512xf32>,
    return
  }
  func.func @transform_0(%arg0: i32) -> (i32, i32, i32) {
    %c0_i32 = arith.constant 0 : i32
    %c0_i32_0 = arith.constant 0 : i32
    %c0_i32_1 = arith.constant 0 : i32
    return %c0_i32, %c0_i32_0, %arg0 : i32, i32, i32
  }
  func.func @transform_1(%arg0: i32) -> (i32, i32) {
    %c0_i32 = arith.constant 0 : i32
    %c0_i32_0 = arith.constant 0 : i32
    return %c0_i32, %arg0 : i32, i32
  }
}

module attributes {stable_mosaic.version = 11 : i64} {
  func.func @_conv_stats_kernel(%arg0: i32, %arg1: memref<8x112xf32, #tpu.memory_space<vmem>>, %arg2: memref<112x512xf32, #tpu.memory_space<vmem>>, %arg3: memref<8x512xf32, #tpu.memory_space<vmem>>, %arg4: memref<8x128xf32, #tpu.memory_space<vmem>>) attributes {dimension_semantics = [#tpu.dimension_semantics<parallel>], iteration_bounds = array<i64: 2>, scalar_prefetch = 0 : i64, scratch_operands = 0 : i64, tpu.core_type = #tpu.core_type<tc>, window_params = [{pipeline_mode = #tpu.pipeline_mode<synchronous>, transform_indices = @transform_0, window_bounds = array<i64: 8, 112>}, {transform_indices = @transform_1, window_bounds = array<i64: 112, 512>}, {transform_indices = @transform_2, window_bounds = array<i64: 8, 512>}, {transform_indices = @transform_3, window_bounds = array<i64: 8, 128>}]} {
    %c0 = arith.constant 0 : index
    %c0_0 = arith.constant 0 : index
    %0 = vector.load %arg1[%c0, %c0_0] : memref<8x112xf32, #tpu.memory_space<vmem>>, vector<8x112xf32>
    %c0_1 = arith.constant 0 : index
    %c0_2 = arith.constant 0 : index
    %1 = vector.load %arg2[%c0_1, %c0_2] : memref<112x512xf32, #tpu.memory_space<vmem>>, vector<112x512xf32>
    %cst = arith.constant dense<0.000000e+00> : vector<8x512xf32>
    %2 = tpu.matmul %0, %1, %cst {dimension_numbers = #tpu.dot_dimension_numbers<[1], [0], [0], [1], [0, 0, 1, 1], [], []>} : vector<8x112xf32>, vector<112x512xf32>, vector<8x512xf32> -> vector<8x512xf32>
    %c0_3 = arith.constant 0 : index
    %c0_4 = arith.constant 0 : index
    %3 = vector.load %arg3[%c0_3, %c0_4] : memref<8x512xf32, #tpu.memory_space<vmem>>, vector<8x512xf32>
    tpu.vector_store %arg3[%c0_3, %c0_4], %2 {strides = array<i32>} : memref<8x512xf32, #tpu.memory_space<vmem>>, vector<8x512xf32>,
    %cst_5 = arith.constant dense<0.000000e+00> : vector<8xf32>
    %4 = vector.multi_reduction <add>, %2, %cst_5 [1] : vector<8x512xf32> to vector<8xf32>
    %5 = vector.shape_cast %4 : vector<8xf32> to vector<8x1xf32>
    %6 = arith.mulf %2, %2 : vector<8x512xf32>
    %cst_6 = arith.constant dense<0.000000e+00> : vector<8xf32>
    %7 = vector.multi_reduction <add>, %6, %cst_6 [1] : vector<8x512xf32> to vector<8xf32>
    %8 = vector.shape_cast %7 : vector<8xf32> to vector<8x1xf32>
    %9 = tpu.iota {dimensions = array<i32: 1>} : vector<8x128xi32>
    %c0_i32 = arith.constant 0 : i32
    %10 = vector.broadcast %c0_i32 : i32 to vector<8x128xi32>
    %11 = arith.cmpi eq, %9, %10 : vector<8x128xi32>
    %cst_7 = arith.constant 0.000000e+00 : f32
    %12 = vector.shape_cast %5 : vector<8x1xf32> to vector<8x1xf32>
    %13 = vector.broadcast %12 : vector<8x1xf32> to vector<8x128xf32>
    %14 = vector.broadcast %cst_7 : f32 to vector<8x128xf32>
    %15 = arith.select %11, %13, %14 : vector<8x128xi1>, vector<8x128xf32>
    %c1_i32 = arith.constant 1 : i32
    %16 = vector.broadcast %c1_i32 : i32 to vector<8x128xi32>
    %17 = arith.cmpi eq, %9, %16 : vector<8x128xi32>
    %cst_8 = arith.constant 0.000000e+00 : f32
    %18 = vector.shape_cast %8 : vector<8x1xf32> to vector<8x1xf32>
    %19 = vector.broadcast %18 : vector<8x1xf32> to vector<8x128xf32>
    %20 = vector.broadcast %cst_8 : f32 to vector<8x128xf32>
    %21 = arith.select %17, %19, %20 : vector<8x128xi1>, vector<8x128xf32>
    %22 = arith.addf %15, %21 : vector<8x128xf32>
    %c0_9 = arith.constant 0 : index
    %c0_10 = arith.constant 0 : index
    %23 = vector.load %arg4[%c0_9, %c0_10] : memref<8x128xf32, #tpu.memory_space<vmem>>, vector<8x128xf32>
    tpu.vector_store %arg4[%c0_9, %c0_10], %22 {strides = array<i32>} : memref<8x128xf32, #tpu.memory_space<vmem>>, vector<8x128xf32>,
    return
  }
  func.func @transform_0(%arg0: i32) -> (i32, i32) {
    %c0_i32 = arith.constant 0 : i32
    %c0_i32_0 = arith.constant 0 : i32
    %c0_i32_1 = arith.constant 0 : i32
    return %c0_i32, %c0_i32_0 : i32, i32
  }
  func.func @transform_1(%arg0: i32) -> (i32, i32) {
    %c0_i32 = arith.constant 0 : i32
    %c0_i32_0 = arith.constant 0 : i32
    return %c0_i32, %arg0 : i32, i32
  }
  func.func @transform_2(%arg0: i32) -> (i32, i32) {
    %c0_i32 = arith.constant 0 : i32
    %c0_i32_0 = arith.constant 0 : i32
    return %c0_i32, %arg0 : i32, i32
  }
  func.func @transform_3(%arg0: i32) -> (i32, i32) {
    %c0_i32 = arith.constant 0 : i32
    %c0_i32_0 = arith.constant 0 : i32
    return %arg0, %c0_i32 : i32, i32
  }
}

module attributes {stable_mosaic.version = 11 : i64} {
  func.func @_bn_relu_kernel(%arg0: i32, %arg1: memref<8x512xf32, #tpu.memory_space<vmem>>, %arg2: memref<8x1xf32, #tpu.memory_space<vmem>>, %arg3: memref<8x1xf32, #tpu.memory_space<vmem>>, %arg4: memref<8x512xf32, #tpu.memory_space<vmem>>) attributes {dimension_semantics = [#tpu.dimension_semantics<parallel>], iteration_bounds = array<i64: 2>, scalar_prefetch = 0 : i64, scratch_operands = 0 : i64, tpu.core_type = #tpu.core_type<tc>, window_params = [{transform_indices = @transform_0, window_bounds = array<i64: 8, 512>}, {pipeline_mode = #tpu.pipeline_mode<synchronous>, transform_indices = @transform_1, window_bounds = array<i64: 8, 1>}, {pipeline_mode = #tpu.pipeline_mode<synchronous>, transform_indices = @transform_2, window_bounds = array<i64: 8, 1>}, {transform_indices = @transform_3, window_bounds = array<i64: 8, 512>}]} {
    %c0 = arith.constant 0 : index
    %c0_0 = arith.constant 0 : index
    %0 = vector.load %arg1[%c0, %c0_0] : memref<8x512xf32, #tpu.memory_space<vmem>>, vector<8x512xf32>
    %c0_1 = arith.constant 0 : index
    %c0_2 = arith.constant 0 : index
    %1 = vector.load %arg2[%c0_1, %c0_2] : memref<8x1xf32, #tpu.memory_space<vmem>>, vector<8x1xf32>
    %2 = vector.broadcast %1 : vector<8x1xf32> to vector<8x512xf32>
    %3 = arith.mulf %0, %2 : vector<8x512xf32>
    %c0_3 = arith.constant 0 : index
    %c0_4 = arith.constant 0 : index
    %4 = vector.load %arg3[%c0_3, %c0_4] : memref<8x1xf32, #tpu.memory_space<vmem>>, vector<8x1xf32>
    %5 = vector.broadcast %4 : vector<8x1xf32> to vector<8x512xf32>
    %6 = arith.addf %3, %5 : vector<8x512xf32>
    %cst = arith.constant 0.000000e+00 : f32
    %7 = vector.broadcast %cst : f32 to vector<8x512xf32>
    %8 = arith.maximumf %6, %7 : vector<8x512xf32>
    %c0_5 = arith.constant 0 : index
    %c0_6 = arith.constant 0 : index
    %9 = vector.load %arg4[%c0_5, %c0_6] : memref<8x512xf32, #tpu.memory_space<vmem>>, vector<8x512xf32>
    tpu.vector_store %arg4[%c0_5, %c0_6], %8 {strides = array<i32>} : memref<8x512xf32, #tpu.memory_space<vmem>>, vector<8x512xf32>,
    return
  }
  func.func @transform_0(%arg0: i32) -> (i32, i32) {
    %c0_i32 = arith.constant 0 : i32
    %c0_i32_0 = arith.constant 0 : i32
    return %c0_i32, %arg0 : i32, i32
  }
  func.func @transform_1(%arg0: i32) -> (i32, i32) {
    %c0_i32 = arith.constant 0 : i32
    %c0_i32_0 = arith.constant 0 : i32
    %c0_i32_1 = arith.constant 0 : i32
    return %c0_i32, %c0_i32_0 : i32, i32
  }
  func.func @transform_2(%arg0: i32) -> (i32, i32) {
    %c0_i32 = arith.constant 0 : i32
    %c0_i32_0 = arith.constant 0 : i32
    %c0_i32_1 = arith.constant 0 : i32
    return %c0_i32, %c0_i32_0 : i32, i32
  }
  func.func @transform_3(%arg0: i32) -> (i32, i32) {
    %c0_i32 = arith.constant 0 : i32
    %c0_i32_0 = arith.constant 0 : i32
    return %c0_i32, %arg0 : i32, i32
  }
}

module attributes {stable_mosaic.version = 11 : i64} {
  func.func @_conv_stats_kernel(%arg0: i32, %arg1: memref<8x216xf32, #tpu.memory_space<vmem>>, %arg2: memref<216x512xf32, #tpu.memory_space<vmem>>, %arg3: memref<8x512xf32, #tpu.memory_space<vmem>>, %arg4: memref<8x128xf32, #tpu.memory_space<vmem>>) attributes {dimension_semantics = [#tpu.dimension_semantics<parallel>], iteration_bounds = array<i64: 2>, scalar_prefetch = 0 : i64, scratch_operands = 0 : i64, tpu.core_type = #tpu.core_type<tc>, window_params = [{pipeline_mode = #tpu.pipeline_mode<synchronous>, transform_indices = @transform_0, window_bounds = array<i64: 8, 216>}, {transform_indices = @transform_1, window_bounds = array<i64: 216, 512>}, {transform_indices = @transform_2, window_bounds = array<i64: 8, 512>}, {transform_indices = @transform_3, window_bounds = array<i64: 8, 128>}]} {
    %c0 = arith.constant 0 : index
    %c0_0 = arith.constant 0 : index
    %0 = vector.load %arg1[%c0, %c0_0] : memref<8x216xf32, #tpu.memory_space<vmem>>, vector<8x216xf32>
    %c0_1 = arith.constant 0 : index
    %c0_2 = arith.constant 0 : index
    %1 = vector.load %arg2[%c0_1, %c0_2] : memref<216x512xf32, #tpu.memory_space<vmem>>, vector<216x512xf32>
    %cst = arith.constant dense<0.000000e+00> : vector<8x512xf32>
    %2 = tpu.matmul %0, %1, %cst {dimension_numbers = #tpu.dot_dimension_numbers<[1], [0], [0], [1], [0, 0, 1, 1], [], []>} : vector<8x216xf32>, vector<216x512xf32>, vector<8x512xf32> -> vector<8x512xf32>
    %c0_3 = arith.constant 0 : index
    %c0_4 = arith.constant 0 : index
    %3 = vector.load %arg3[%c0_3, %c0_4] : memref<8x512xf32, #tpu.memory_space<vmem>>, vector<8x512xf32>
    tpu.vector_store %arg3[%c0_3, %c0_4], %2 {strides = array<i32>} : memref<8x512xf32, #tpu.memory_space<vmem>>, vector<8x512xf32>,
    %cst_5 = arith.constant dense<0.000000e+00> : vector<8xf32>
    %4 = vector.multi_reduction <add>, %2, %cst_5 [1] : vector<8x512xf32> to vector<8xf32>
    %5 = vector.shape_cast %4 : vector<8xf32> to vector<8x1xf32>
    %6 = arith.mulf %2, %2 : vector<8x512xf32>
    %cst_6 = arith.constant dense<0.000000e+00> : vector<8xf32>
    %7 = vector.multi_reduction <add>, %6, %cst_6 [1] : vector<8x512xf32> to vector<8xf32>
    %8 = vector.shape_cast %7 : vector<8xf32> to vector<8x1xf32>
    %9 = tpu.iota {dimensions = array<i32: 1>} : vector<8x128xi32>
    %c0_i32 = arith.constant 0 : i32
    %10 = vector.broadcast %c0_i32 : i32 to vector<8x128xi32>
    %11 = arith.cmpi eq, %9, %10 : vector<8x128xi32>
    %cst_7 = arith.constant 0.000000e+00 : f32
    %12 = vector.shape_cast %5 : vector<8x1xf32> to vector<8x1xf32>
    %13 = vector.broadcast %12 : vector<8x1xf32> to vector<8x128xf32>
    %14 = vector.broadcast %cst_7 : f32 to vector<8x128xf32>
    %15 = arith.select %11, %13, %14 : vector<8x128xi1>, vector<8x128xf32>
    %c1_i32 = arith.constant 1 : i32
    %16 = vector.broadcast %c1_i32 : i32 to vector<8x128xi32>
    %17 = arith.cmpi eq, %9, %16 : vector<8x128xi32>
    %cst_8 = arith.constant 0.000000e+00 : f32
    %18 = vector.shape_cast %8 : vector<8x1xf32> to vector<8x1xf32>
    %19 = vector.broadcast %18 : vector<8x1xf32> to vector<8x128xf32>
    %20 = vector.broadcast %cst_8 : f32 to vector<8x128xf32>
    %21 = arith.select %17, %19, %20 : vector<8x128xi1>, vector<8x128xf32>
    %22 = arith.addf %15, %21 : vector<8x128xf32>
    %c0_9 = arith.constant 0 : index
    %c0_10 = arith.constant 0 : index
    %23 = vector.load %arg4[%c0_9, %c0_10] : memref<8x128xf32, #tpu.memory_space<vmem>>, vector<8x128xf32>
    tpu.vector_store %arg4[%c0_9, %c0_10], %22 {strides = array<i32>} : memref<8x128xf32, #tpu.memory_space<vmem>>, vector<8x128xf32>,
    return
  }
  func.func @transform_0(%arg0: i32) -> (i32, i32) {
    %c0_i32 = arith.constant 0 : i32
    %c0_i32_0 = arith.constant 0 : i32
    %c0_i32_1 = arith.constant 0 : i32
    return %c0_i32, %c0_i32_0 : i32, i32
  }
  func.func @transform_1(%arg0: i32) -> (i32, i32) {
    %c0_i32 = arith.constant 0 : i32
    %c0_i32_0 = arith.constant 0 : i32
    return %c0_i32, %arg0 : i32, i32
  }
  func.func @transform_2(%arg0: i32) -> (i32, i32) {
    %c0_i32 = arith.constant 0 : i32
    %c0_i32_0 = arith.constant 0 : i32
    return %c0_i32, %arg0 : i32, i32
  }
  func.func @transform_3(%arg0: i32) -> (i32, i32) {
    %c0_i32 = arith.constant 0 : i32
    %c0_i32_0 = arith.constant 0 : i32
    return %arg0, %c0_i32 : i32, i32
  }
}

</mosaic_0001>

<bundles_post_ra>
// kernel: down_forward.5
= control target key start
LH: loop header
LB: loop body
LE: loop exit
PB: predicated region body
PF: predicated region fallthrough
CT: control target
= control target key end

     0   :  { %s335_s6 = smov 0   ;;  %s337_s7 = smov 0   ;;  %s408_s0 = inlined_call_operand.vmem [shape: f32[8,4,1024], index: 0, kind: input, shape index: {}]   ;;  %s409_s1 = inlined_call_operand.vmem [shape: f32[4,1024], index: 1, kind: output, shape index: {}]  }
   0x1   :  { %s339_s8 = smov 0  }
   0x2 LB: > { %s263_s9 = sadd.s32 4294967295, %s323_s8   ;;  %s352_s10 = sadd.s32 1, %s323_s8   ;;  %s323_s8 = sphi %s339_s8, %s412_s8   ;;  %s319_s7 = sphi %s337_s7, %s411_s7   ;;  %s315_s6 = sphi %s335_s6, %s410_s6  }
   0x3   : > { %s15_s11 = ssub.s32 %s323_s8, %s352_s10  ;;  %s18_s12 = sadd.s32 1, %s319_s7 }
   0x4   : > { %p16_p0 = scmp.eq.s32.totalorder %s15_s11, 0  ;;  %p25_p1 = scmp.ne.s32.totalorder %s319_s7, %s315_s6 }
   0x5   : > { %p26_p2 = scmp.eq.s32.totalorder %s323_s8, 0  ;;  %p266_p4 = scmp.ge.s32.totalorder %s323_s8, 2 }
   0x6   : > { %s361_s13 = scalar_select %p16_p0, %s319_s7, %s18_s12  }
   0x7   : > { %p27_p3 = por %p26_p2, %p25_p1  ;;  %77 = sbr.rel (%p266_p4) target bundleno = 26 (0x1a), region = 16 }
   0xe   : > { %80 = sbr.rel (!%p27_p3) target bundleno = 26 (0x1a), region = 20  ;;  %s82_s14 = sand.u32 (%p27_p3), 1, %s319_s7  }
   0xf   : > { %s276_s15 = sshll.u32 (%p27_p3), %s323_s8, 4  ;;  %s267_s16 = sshll.u32 (%p27_p3), %s82_s14, 7 }
  0x10   : > { %s369_s19 = scalar_lea.vmem (%p27_p3), %s408_s0, %s276_s15  ;;  %s84_s20 = scalar_lea.vmem (%p27_p3), [#allocation2], %s267_s16 }
  0x11   : > { %v100_v0 = vld [vmem:[%s369_s19] sm:$0xff] (%p27_p3)  ;;  %v102_v1 = vld [vmem:[%s369_s19 + $0x8] sm:$0xff] (%p27_p3) }
  0x12   : > { %v104_v2 = vld [vmem:[%s369_s19 + $0x20] sm:$0xff] (%p27_p3)  ;;  %101 = vst [vmem:[%s84_s20] sm:$0xff] (%p27_p3), %v100_v0  ;;  %103 = vst [vmem:[%s84_s20 + $0x8] sm:$0xff] (%p27_p3), %v102_v1  ;;  %v106_v3 = vld [vmem:[%s369_s19 + $0x28] sm:$0xff] (%p27_p3) }
  0x13   : > { %105 = vst [vmem:[%s84_s20 + $0x10] sm:$0xff] (%p27_p3), %v104_v2  ;;  %v108_v4 = vld [vmem:[%s369_s19 + $0x40] sm:$0xff] (%p27_p3)  ;;  %v110_v5 = vld [vmem:[%s369_s19 + $0x48] sm:$0xff] (%p27_p3)  ;;  %107 = vst [vmem:[%s84_s20 + $0x18] sm:$0xff] (%p27_p3), %v106_v3 }
  0x14   : > { %109 = vst [vmem:[%s84_s20 + $0x20] sm:$0xff] (%p27_p3), %v108_v4  ;;  %111 = vst [vmem:[%s84_s20 + $0x28] sm:$0xff] (%p27_p3), %v110_v5  ;;  %v112_v6 = vld [vmem:[%s369_s19 + $0x60] sm:$0xff] (%p27_p3)  ;;  %v114_v7 = vld [vmem:[%s369_s19 + $0x68] sm:$0xff] (%p27_p3) }
  0x15   : > { %v116_v8 = vld [vmem:[%s369_s19 + $0x80] sm:$0xff]  ;;  %113 = vst [vmem:[%s84_s20 + $0x30] sm:$0xff] %v112_v6  ;;  %115 = vst [vmem:[%s84_s20 + $0x38] sm:$0xff] %v114_v7  ;;  %v118_v9 = vld [vmem:[%s369_s19 + $0x88] sm:$0xff] }
  0x16   : > { %117 = vst [vmem:[%s84_s20 + $0x40] sm:$0xff] %v116_v8  ;;  %v120_v10 = vld [vmem:[%s369_s19 + $0xa0] sm:$0xff]  ;;  %v122_v11 = vld [vmem:[%s369_s19 + $0xa8] sm:$0xff]  ;;  %119 = vst [vmem:[%s84_s20 + $0x48] sm:$0xff] %v118_v9 }
  0x17   : > { %121 = vst [vmem:[%s84_s20 + $0x50] sm:$0xff] %v120_v10  ;;  %123 = vst [vmem:[%s84_s20 + $0x58] sm:$0xff] %v122_v11  ;;  %v124_v12 = vld [vmem:[%s369_s19 + $0xc0] sm:$0xff]  ;;  %v126_v13 = vld [vmem:[%s369_s19 + $0xc8] sm:$0xff] }
  0x18   : > { %v128_v14 = vld [vmem:[%s369_s19 + $0xe0] sm:$0xff]  ;;  %125 = vst [vmem:[%s84_s20 + $0x60] sm:$0xff] %v124_v12  ;;  %127 = vst [vmem:[%s84_s20 + $0x68] sm:$0xff] %v126_v13  ;;  %v130_v15 = vld [vmem:[%s369_s19 + $0xe8] sm:$0xff] }
  0x19   : > { %129 = vst [vmem:[%s84_s20 + $0x70] sm:$0xff] %v128_v14  ;;  %131 = vst [vmem:[%s84_s20 + $0x78] sm:$0xff] %v130_v15 }
  0x1a PF: > { %p270_p5 = scmp.ge.s32.totalorder %s323_s8, 1  ;;  %p136_p6 = scmp.lt.s32.totalorder %s323_s8, 3 }
  0x1c   : > { %p137_p7 = pnand %p270_p5, %p136_p6 }
  0x1d   : > { %s143_s21 = sand.u32 (!%p137_p7), 1, %s315_s6   ;;  %s272_s22 = sshll.u32 (!%p137_p7), %s263_s9, 2 }
  0x1e   : > { %140 = sbr.rel (%p137_p7) target bundleno = 45 (0x2d), region = 43  ;;  %s271_s23 = sshll.u32 (!%p137_p7), %s143_s21, 7 }
  0x1f   : > { %p164_p8 = scmp.lt.s32.totalorder (!%p137_p7), %s272_s22, 7  ;;  %s145_s24 = scalar_lea.vmem (!%p137_p7), [#allocation2], %s271_s23 }
  0x20   : > { %v169_v16 = vld [vmem:[%s145_s24] sm:$0xff] (!%p137_p7)  ;;  %v171_v17 = vld [vmem:[%s145_s24 + $0x10] sm:$0xff] (!%p137_p7)  ;;  %v170_v26 = vld [vmem:[%s145_s24 + $0x8] sm:$0xff] (!%p137_p7) }
  0x21   : > { %v173_v18 = vld [vmem:[%s145_s24 + $0x20] sm:$0xff] (!%p137_p7)  ;;  %v175_v19 = vld [vmem:[%s145_s24 + $0x30] sm:$0xff] (!%p137_p7)  ;;  %v172_v28 = vld [vmem:[%s145_s24 + $0x18] sm:$0xff] (!%p137_p7) }
  0x22   : > { %v177_v20 = vld [vmem:[%s145_s24 + $0x40] sm:$0xff] (!%p137_p7)  ;;  %v179_v21 = vld [vmem:[%s145_s24 + $0x50] sm:$0xff] (!%p137_p7)  ;;  %v185_v22 = vmax.f32 (!%p137_p7), %v169_v16, %v173_v18  ;;  %v186_v25 = vmax.f32 (!%p137_p7), %v171_v17, %v175_v19  ;;  %v174_v29 = vld [vmem:[%s145_s24 + $0x28] sm:$0xff] (!%p137_p7) }
  0x23   : > { %v181_v23 = vld [vmem:[%s145_s24 + $0x60] sm:$0xff] (!%p137_p7)  ;;  %v183_v24 = vld [vmem:[%s145_s24 + $0x70] sm:$0xff] (!%p137_p7)  ;;  %v176_v30 = vld [vmem:[%s145_s24 + $0x38] sm:$0xff] (!%p137_p7)  ;;  %v192_v34 = vmax.f32 (!%p137_p7), %v170_v26, %v174_v29 }
  0x24   : > { %v187_v27 = vmax.f32 (!%p137_p7), %v185_v22, %v177_v20  ;;  %v188_v31 = vmax.f32 (!%p137_p7), %v186_v25, %v179_v21  ;;  %v178_v32 = vld [vmem:[%s145_s24 + $0x48] sm:$0xff] (!%p137_p7)  ;;  %v180_v33 = vld [vmem:[%s145_s24 + $0x58] sm:$0xff] (!%p137_p7)  ;;  %v193_v35 = vmax.f32 (!%p137_p7), %v172_v28, %v176_v30 }
  0x25   : > { %s414_s22 = smov (!%p164_p8, %s272_s22), 7  ;;  %v182_v37 = vld [vmem:[%s145_s24 + $0x68] sm:$0xff]  ;;  %v184_v38 = vld [vmem:[%s145_s24 + $0x78] sm:$0xff]  ;;  %v194_v40 = vmax.f32 %v192_v34, %v178_v32 }
  0x26   : > { %s273_s25 = sshll.u32 %s414_s22, 2  ;;  %v189_v36 = vmax.f32 %v187_v27, %v181_v23  ;;  %v190_v39 = vmax.f32 %v188_v31, %v183_v24  ;;  %v195_v41 = vmax.f32 %v193_v35, %v180_v33 }
  0x27   : > { %s167_s28 = scalar_lea.vmem %s409_s1, %s273_s25  ;;  %v196_v43 = vmax.f32 %v194_v40, %v182_v37 }
  0x28   : > { %v191_v42 = vmax.f32 %v189_v36, %v190_v39  ;;  %v197_v44 = vmax.f32 %v195_v41, %v184_v38 }
  0x2a   : > { %199 = vst [vmem:[%s167_s28] sm:$0xff] %v191_v42  ;;  %v198_v45 = vmax.f32 %v196_v43, %v197_v44 }
  0x2c   : > { %200 = vst [vmem:[%s167_s28 + $0x8] sm:$0xff] %v198_v45 }
  0x2d PF: > { %p8_p9 = scmp.ge.s32.totalorder %s352_s10, 4   ;;  %s410_s6 = smov %s319_s7 }
  0x2e   : > { %s411_s7 = smov %s361_s13  ;;  %s412_s8 = smov %s352_s10 }
  0x2f   :  { %10 = sbr.rel (!%p8_p9) target bundleno = 2 (0x2), region = 82 }

// kernel: down_forward.7
= control target key start
LH: loop header
LB: loop body
LE: loop exit
PB: predicated region body
PF: predicated region fallthrough
CT: control target
= control target key end

     0   :  { %s312_s12 = smov 0   ;;  %s335_s0 = inlined_call_operand.vmem [shape: f32[8,1024], index: 0, kind: input, shape index: {}]   ;;  %s336_s1 = inlined_call_operand.vmem [shape: f32[8,1], index: 1, kind: input, shape index: {}]   ;;  %s337_s2 = inlined_call_operand.vmem [shape: f32[8,1], index: 2, kind: input, shape index: {}]   ;;  %s338_s3 = inlined_call_operand.vmem [shape: f32[8,1024], index: 3, kind: output, shape index: {}]  }
   0x1 LB: > { %s262_s13 = sadd.s32 4294967295, %s289_s12   ;;  %p266_p0 = scmp.ge.s32.totalorder %s289_s12, 1  ;;  %s289_s12 = sphi %s312_s12, %s13_s12  }
   0x2   : > { %p138_p1 = scmp.lt.s32.totalorder %s289_s12, 3 }
   0x4   : > { %p139_p2 = pnand %p266_p0, %p138_p1 }
   0x5   : > { %v178_v0 = vld [vmem:[%s336_s1] sm:$0xff] (!%p139_p2)  ;;  %v291_v1 = vmov (!%p139_p2), 0   ;;  %s267_s18 = sshll.u32 (!%p139_p2), %s262_s13, 2 }
   0x6   : > { %142 = sbr.rel (%p139_p2) target bundleno = 145 (0x91), region = 32  ;;  %282 = vset.pattern.permute.xlu0 (!%p139_p2), %v291_v1  ;;  %v188_v2 = vld [vmem:[%s337_s2] sm:$0xff] (!%p139_p2)  ;;  %p163_p3 = scmp.lt.s32.totalorder (!%p139_p2), %s267_s18, 7 }
   0x7   : > { %181 = vperm.xlu0 (!%p139_p2), %282, %v178_v0  }
   0xb   : > { %191 = vperm.xlu0 (!%p139_p2), %282, %v188_v2  }
   0xd   : > { %s340_s18 = smov (!%p163_p3, %s267_s18), 7 }
   0xe   : > { %s268_s19 = sshll.u32 %s340_s18, 3 }
   0xf   : > { %s166_s22 = scalar_lea.vmem %s335_s0, %s268_s19  ;;  %s172_s25 = scalar_lea.vmem %s338_s3, %s268_s19 }
  0x10   : > { %v174_v4 = vld [vmem:[%s166_s22] sm:$0xff]  ;;  %v175_v5 = vld [vmem:[%s166_s22 + $0x8] sm:$0xff]  ;;  %v176_v6 = vld [vmem:[%s166_s22 + $0x10] sm:$0xff] }
  0x11   : > { %v177_v7 = vld [vmem:[%s166_s22 + $0x18] sm:$0xff] }
  0x86   : > { %v182_v3 = vpop.permute.xlu0 %181 }
  0x87   : > { %v184_v8 = vmul.f32 %v182_v3, %v174_v4  ;;  %v185_v9 = vmul.f32 %v182_v3, %v175_v5  ;;  %v186_v10 = vmul.f32 %v182_v3, %v176_v6  ;;  %v187_v12 = vmul.f32 %v182_v3, %v177_v7 }
  0x8a   : > { %v192_v11 = vpop.permute.xlu0 %191 }
  0x8b   : > { %v194_v13 = vadd.f32 %v192_v11, %v184_v8  ;;  %v195_v14 = vadd.f32 %v192_v11, %v185_v9  ;;  %v196_v15 = vadd.f32 %v192_v11, %v186_v10  ;;  %v197_v16 = vadd.f32 %v192_v11, %v187_v12 }
  0x8d   : > { %v198_v17 = vmax.f32 %v194_v13, 0.0  ;;  %v199_v18 = vmax.f32 %v195_v14, 0.0  ;;  %v200_v19 = vmax.f32 %v196_v15, 0.0  ;;  %v201_v20 = vmax.f32 %v197_v16, 0.0 }
  0x8f   : > { %202 = vst [vmem:[%s172_s25] sm:$0xff] %v198_v17  ;;  %203 = vst [vmem:[%s172_s25 + $0x8] sm:$0xff] %v199_v18 }
  0x90   : > { %204 = vst [vmem:[%s172_s25 + $0x10] sm:$0xff] %v200_v19  ;;  %205 = vst [vmem:[%s172_s25 + $0x18] sm:$0xff] %v201_v20 }
  0x91 PF: > { %s13_s12 = sadd.s32 1, %s289_s12  }
  0x92   : > { %p10_p4 = scmp.ge.s32.totalorder %s13_s12, 4  }
  0x94   :  { %12 = sbr.rel (!%p10_p4) target bundleno = 1 (0x1), region = 62 }

// kernel: down_forward.6
= control target key start
LH: loop header
LB: loop body
LE: loop exit
PB: predicated region body
PF: predicated region fallthrough
CT: control target
= control target key end

     0   :  { %s779_s12 = smov 0   ;;  %s781_s13 = smov 0   ;;  %s1014_s0 = inlined_call_operand.vmem [shape: f32[8,112], index: 0, kind: input, shape index: {}]   ;;  %s1015_s1 = inlined_call_operand.vmem [shape: f32[112,1024], index: 1, kind: input, shape index: {}]   ;;  %s1016_s2 = inlined_call_operand.vmem [shape: f32[8,1024], index: 2, kind: output, shape index: {0}]   ;;  %s1017_s3 = inlined_call_operand.vmem [shape: f32[16,128], index: 3, kind: output, shape index: {1}]  }
   0x1   :  { %s783_s14 = smov 0  }
   0x2 LB: > { %s795_s15 = sadd.s32 4294967295, %s756_s14   ;;  %s798_s16 = sadd.s32 1, %s756_s14   ;;  %s756_s14 = sphi %s783_s14, %s1020_s14   ;;  %s752_s13 = sphi %s781_s13, %s1019_s13   ;;  %s748_s12 = sphi %s779_s12, %s1018_s12  }
   0x3   : > { %s39_s17 = ssub.s32 %s756_s14, %s798_s16  ;;  %s42_s18 = sadd.s32 1, %s752_s13 }
   0x4   : > { %p40_p0 = scmp.eq.s32.totalorder %s39_s17, 0  ;;  %p49_p1 = scmp.ne.s32.totalorder %s752_s13, %s748_s12 }
   0x5   : > { %p50_p2 = scmp.eq.s32.totalorder %s756_s14, 0  ;;  %p639_p4 = scmp.ge.s32.totalorder %s756_s14, 2 }
   0x6   : > { %s807_s19 = scalar_select %p40_p0, %s752_s13, %s42_s18  }
   0x7   : > { %p51_p3 = por %p50_p2, %p49_p1  ;;  %130 = sbr.rel (%p639_p4) target bundleno = 47 (0x2f), region = 20 }
   0xe   : > { %133 = sbr.rel (!%p51_p3) target bundleno = 47 (0x2f), region = 24  ;;  %s135_s20 = sand.u32 (%p51_p3), 1, %s752_s13  }
   0xf   : > { %s650_s21 = sshll.u32 (%p51_p3), %s756_s14, 5  ;;  %s707_s22 = smul.u32 (%p51_p3), 448, %s135_s20 }
  0x10   : > { %s815_s25 = scalar_lea.vmem (%p51_p3), %s1015_s1, %s650_s21 }
  0x11   : > { %v153_v0 = vld [vmem:[%s815_s25] sm:$0xff] (%p51_p3)  ;;  %v155_v1 = vld [vmem:[%s815_s25 + $0x8] sm:$0xff] (%p51_p3)  ;;  %v157_v2 = vld [vmem:[%s815_s25 + $0x10] sm:$0xff] (%p51_p3)  ;;  %s823_s26 = scalar_lea.vmem (%p51_p3), [#allocation2], %s707_s22 }
  0x12   : > { %v159_v3 = vld [vmem:[%s815_s25 + $0x18] sm:$0xff] (%p51_p3)  ;;  %v161_v4 = vld [vmem:[%s815_s25 + $0x40] sm:$0xff] (%p51_p3)  ;;  %v163_v5 = vld [vmem:[%s815_s25 + $0x48] sm:$0xff] (%p51_p3)  ;;  %154 = vst [vmem:[%s823_s26] sm:$0xff] (%p51_p3), %v153_v0 }
  0x13   : > { %156 = vst [vmem:[%s823_s26 + $0x8] sm:$0xff] (%p51_p3), %v155_v1  ;;  %158 = vst [vmem:[%s823_s26 + $0x10] sm:$0xff] (%p51_p3), %v157_v2  ;;  %v165_v6 = vld [vmem:[%s815_s25 + $0x50] sm:$0xff] (%p51_p3)  ;;  %v167_v7 = vld [vmem:[%s815_s25 + $0x58] sm:$0xff] (%p51_p3) }
  0x14   : > { %160 = vst [vmem:[%s823_s26 + $0x18] sm:$0xff] (%p51_p3), %v159_v3  ;;  %162 = vst [vmem:[%s823_s26 + $0x20] sm:$0xff] (%p51_p3), %v161_v4  ;;  %v169_v8 = vld [vmem:[%s815_s25 + $0x80] sm:$0xff] (%p51_p3)  ;;  %v171_v9 = vld [vmem:[%s815_s25 + $0x88] sm:$0xff] (%p51_p3) }
  0x15   : > { %164 = vst [vmem:[%s823_s26 + $0x28] sm:$0xff] %v163_v5  ;;  %166 = vst [vmem:[%s823_s26 + $0x30] sm:$0xff] %v165_v6  ;;  %v173_v10 = vld [vmem:[%s815_s25 + $0x90] sm:$0xff]  ;;  %v175_v11 = vld [vmem:[%s815_s25 + $0x98] sm:$0xff] }
  0x16   : > { %168 = vst [vmem:[%s823_s26 + $0x38] sm:$0xff] %v167_v7  ;;  %170 = vst [vmem:[%s823_s26 + $0x40] sm:$0xff] %v169_v8  ;;  %v177_v12 = vld [vmem:[%s815_s25 + $0xc0] sm:$0xff]  ;;  %v179_v13 = vld [vmem:[%s815_s25 + $0xc8] sm:$0xff] }
  0x17   : > { %172 = vst [vmem:[%s823_s26 + $0x48] sm:$0xff] %v171_v9  ;;  %174 = vst [vmem:[%s823_s26 + $0x50] sm:$0xff] %v173_v10  ;;  %v181_v14 = vld [vmem:[%s815_s25 + $0xd0] sm:$0xff]  ;;  %v183_v15 = vld [vmem:[%s815_s25 + $0xd8] sm:$0xff] }
  0x18   : > { %176 = vst [vmem:[%s823_s26 + $0x58] sm:$0xff] %v175_v11  ;;  %178 = vst [vmem:[%s823_s26 + $0x60] sm:$0xff] %v177_v12  ;;  %v185_v16 = vld [vmem:[%s815_s25 + $0x100] sm:$0xff]  ;;  %v187_v17 = vld [vmem:[%s815_s25 + $0x108] sm:$0xff] }
  0x19   : > { %180 = vst [vmem:[%s823_s26 + $0x68] sm:$0xff] %v179_v13  ;;  %182 = vst [vmem:[%s823_s26 + $0x70] sm:$0xff] %v181_v14  ;;  %v189_v18 = vld [vmem:[%s815_s25 + $0x110] sm:$0xff]  ;;  %v191_v19 = vld [vmem:[%s815_s25 + $0x118] sm:$0xff] }
  0x1a   : > { %184 = vst [vmem:[%s823_s26 + $0x78] sm:$0xff] %v183_v15  ;;  %186 = vst [vmem:[%s823_s26 + $0x80] sm:$0xff] %v185_v16  ;;  %v193_v20 = vld [vmem:[%s815_s25 + $0x140] sm:$0xff]  ;;  %v195_v21 = vld [vmem:[%s815_s25 + $0x148] sm:$0xff] }
  0x1b   : > { %188 = vst [vmem:[%s823_s26 + $0x88] sm:$0xff] %v187_v17  ;;  %190 = vst [vmem:[%s823_s26 + $0x90] sm:$0xff] %v189_v18  ;;  %v197_v22 = vld [vmem:[%s815_s25 + $0x150] sm:$0xff]  ;;  %v199_v23 = vld [vmem:[%s815_s25 + $0x158] sm:$0xff] }
  0x1c   : > { %192 = vst [vmem:[%s823_s26 + $0x98] sm:$0xff] %v191_v19  ;;  %194 = vst [vmem:[%s823_s26 + $0xa0] sm:$0xff] %v193_v20  ;;  %v201_v24 = vld [vmem:[%s815_s25 + $0x180] sm:$0xff]  ;;  %v203_v25 = vld [vmem:[%s815_s25 + $0x188] sm:$0xff] }
  0x1d   : > { %196 = vst [vmem:[%s823_s26 + $0xa8] sm:$0xff] %v195_v21  ;;  %198 = vst [vmem:[%s823_s26 + $0xb0] sm:$0xff] %v197_v22  ;;  %v205_v26 = vld [vmem:[%s815_s25 + $0x190] sm:$0xff]  ;;  %v207_v27 = vld [vmem:[%s815_s25 + $0x198] sm:$0xff] }
  0x1e   : > { %200 = vst [vmem:[%s823_s26 + $0xb8] sm:$0xff] %v199_v23  ;;  %202 = vst [vmem:[%s823_s26 + $0xc0] sm:$0xff] %v201_v24  ;;  %v209_v28 = vld [vmem:[%s815_s25 + $0x1c0] sm:$0xff]  ;;  %v211_v29 = vld [vmem:[%s815_s25 + $0x1c8] sm:$0xff] }
  0x1f   : > { %204 = vst [vmem:[%s823_s26 + $0xc8] sm:$0xff] %v203_v25  ;;  %206 = vst [vmem:[%s823_s26 + $0xd0] sm:$0xff] %v205_v26  ;;  %v213_v30 = vld [vmem:[%s815_s25 + $0x1d0] sm:$0xff]  ;;  %v215_v31 = vld [vmem:[%s815_s25 + $0x1d8] sm:$0xff] }
  0x20   : > { %208 = vst [vmem:[%s823_s26 + $0xd8] sm:$0xff] %v207_v27  ;;  %210 = vst [vmem:[%s823_s26 + $0xe0] sm:$0xff] %v209_v28  ;;  %v217_v32 = vld [vmem:[%s815_s25 + $0x200] sm:$0xff]  ;;  %v219_v33 = vld [vmem:[%s815_s25 + $0x208] sm:$0xff] }
  0x21   : > { %212 = vst [vmem:[%s823_s26 + $0xe8] sm:$0xff] %v211_v29  ;;  %214 = vst [vmem:[%s823_s26 + $0xf0] sm:$0xff] %v213_v30  ;;  %v221_v34 = vld [vmem:[%s815_s25 + $0x210] sm:$0xff]  ;;  %v223_v35 = vld [vmem:[%s815_s25 + $0x218] sm:$0xff] }
  0x22   : > { %216 = vst [vmem:[%s823_s26 + $0xf8] sm:$0xff] %v215_v31  ;;  %218 = vst [vmem:[%s823_s26 + $0x100] sm:$0xff] %v217_v32  ;;  %v225_v36 = vld [vmem:[%s815_s25 + $0x240] sm:$0xff]  ;;  %v227_v37 = vld [vmem:[%s815_s25 + $0x248] sm:$0xff] }
  0x23   : > { %220 = vst [vmem:[%s823_s26 + $0x108] sm:$0xff] %v219_v33  ;;  %222 = vst [vmem:[%s823_s26 + $0x110] sm:$0xff] %v221_v34  ;;  %v229_v38 = vld [vmem:[%s815_s25 + $0x250] sm:$0xff]  ;;  %v231_v39 = vld [vmem:[%s815_s25 + $0x258] sm:$0xff] }
  0x24   : > { %224 = vst [vmem:[%s823_s26 + $0x118] sm:$0xff] %v223_v35  ;;  %226 = vst [vmem:[%s823_s26 + $0x120] sm:$0xff] %v225_v36  ;;  %v233_v40 = vld [vmem:[%s815_s25 + $0x280] sm:$0xff]  ;;  %v235_v41 = vld [vmem:[%s815_s25 + $0x288] sm:$0xff] }
  0x25   : > { %228 = vst [vmem:[%s823_s26 + $0x128] sm:$0xff] %v227_v37  ;;  %230 = vst [vmem:[%s823_s26 + $0x130] sm:$0xff] %v229_v38  ;;  %v237_v42 = vld [vmem:[%s815_s25 + $0x290] sm:$0xff]  ;;  %v239_v43 = vld [vmem:[%s815_s25 + $0x298] sm:$0xff] }
  0x26   : > { %232 = vst [vmem:[%s823_s26 + $0x138] sm:$0xff] %v231_v39  ;;  %234 = vst [vmem:[%s823_s26 + $0x140] sm:$0xff] %v233_v40  ;;  %v241_v44 = vld [vmem:[%s815_s25 + $0x2c0] sm:$0xff]  ;;  %v243_v45 = vld [vmem:[%s815_s25 + $0x2c8] sm:$0xff] }
  0x27   : > { %236 = vst [vmem:[%s823_s26 + $0x148] sm:$0xff] %v235_v41  ;;  %238 = vst [vmem:[%s823_s26 + $0x150] sm:$0xff] %v237_v42  ;;  %v245_v46 = vld [vmem:[%s815_s25 + $0x2d0] sm:$0xff]  ;;  %v247_v47 = vld [vmem:[%s815_s25 + $0x2d8] sm:$0xff] }
  0x28   : > { %240 = vst [vmem:[%s823_s26 + $0x158] sm:$0xff] %v239_v43  ;;  %242 = vst [vmem:[%s823_s26 + $0x160] sm:$0xff] %v241_v44  ;;  %v249_v48 = vld [vmem:[%s815_s25 + $0x300] sm:$0xff]  ;;  %v251_v49 = vld [vmem:[%s815_s25 + $0x308] sm:$0xff] }
  0x29   : > { %244 = vst [vmem:[%s823_s26 + $0x168] sm:$0xff] %v243_v45  ;;  %246 = vst [vmem:[%s823_s26 + $0x170] sm:$0xff] %v245_v46  ;;  %v253_v50 = vld [vmem:[%s815_s25 + $0x310] sm:$0xff]  ;;  %v255_v51 = vld [vmem:[%s815_s25 + $0x318] sm:$0xff] }
  0x2a   : > { %248 = vst [vmem:[%s823_s26 + $0x178] sm:$0xff] %v247_v47  ;;  %250 = vst [vmem:[%s823_s26 + $0x180] sm:$0xff] %v249_v48  ;;  %v257_v52 = vld [vmem:[%s815_s25 + $0x340] sm:$0xff]  ;;  %v259_v53 = vld [vmem:[%s815_s25 + $0x348] sm:$0xff] }
  0x2b   : > { %252 = vst [vmem:[%s823_s26 + $0x188] sm:$0xff] %v251_v49  ;;  %254 = vst [vmem:[%s823_s26 + $0x190] sm:$0xff] %v253_v50  ;;  %v261_v54 = vld [vmem:[%s815_s25 + $0x350] sm:$0xff]  ;;  %v263_v55 = vld [vmem:[%s815_s25 + $0x358] sm:$0xff] }
  0x2c   : > { %256 = vst [vmem:[%s823_s26 + $0x198] sm:$0xff] %v255_v51  ;;  %258 = vst [vmem:[%s823_s26 + $0x1a0] sm:$0xff] %v257_v52 }
  0x2d   : > { %260 = vst [vmem:[%s823_s26 + $0x1a8] sm:$0xff] %v259_v53  ;;  %262 = vst [vmem:[%s823_s26 + $0x1b0] sm:$0xff] %v261_v54 }
  0x2e   : > { %264 = vst [vmem:[%s823_s26 + $0x1b8] sm:$0xff] %v263_v55 }
  0x2f PF: > { %p642_p5 = scmp.ge.s32.totalorder %s756_s14, 1  ;;  %p269_p6 = scmp.lt.s32.totalorder %s756_s14, 3 }
  0x31   : > { %p270_p7 = pnand %p642_p5, %p269_p6 }
  0x32   : > { %s276_s27 = sand.u32 (!%p270_p7), 1, %s748_s12   ;;  %v758_v56 = vmov (!%p270_p7), 0.0   ;;  %vm371_vm0 = vcmask (!%p270_p7), 916480   ;;  %s643_s5 = sshll.u32 (!%p270_p7), %s795_s15, 2 }
  0x33   : > { %273 = sbr.rel (%p270_p7) target bundleno = 456 (0x1c8), region = 47  ;;  %439 = vmatprep.mubr.f32.mxu0 (!%p270_p7), %v758_v56  ;;  %510 = vmatprep.mubr.f32.mxu1 (!%p270_p7), %v758_v56  ;;  %p305_p8 = scmp.lt.s32.totalorder (!%p270_p7), %s643_s5, 7 }
  0x34   : > { %s708_s28 = smul.u32 (!%p270_p7), 448, %s276_s27  ;;  %p310_p9 = scmp.lt.s32.totalorder (!%p270_p7), %s795_s15, 1 }
  0x36   : > { %s934_s29 = scalar_lea.vmem (!%p270_p7), [#allocation2], %s708_s28 }
  0x37   : > { %v316_v57 = vld [vmem:[%s934_s29 + $0x8] sm:$0xff] (!%p270_p7)  ;;  %v315_v59 = vld [vmem:[%s934_s29] sm:$0xff] (!%p270_p7)  ;;  %v318_v62 = vld [vmem:[%s934_s29 + $0x18] sm:$0xff] (!%p270_p7) }
  0x38   : > { %v320_v58 = vld [vmem:[%s934_s29 + $0x28] sm:$0xff] (!%p270_p7)  ;;  %v319_v61 = vld [vmem:[%s934_s29 + $0x20] sm:$0xff] (!%p270_p7)  ;;  %v322_v63 = vld [vmem:[%s934_s29 + $0x38] sm:$0xff] (!%p270_p7) }
  0x39   : > { %v651_v60 = vpack.c.bf16 (!%p270_p7), %v320_v58, %v316_v57  ;;  %v653_v0 = vpack.c.bf16 (!%p270_p7), %v319_v61, %v315_v59  ;;  %v679_v1 = vpack.c.bf16 (!%p270_p7), %v322_v63, %v318_v62  ;;  %v317_v2 = vld [vmem:[%s934_s29 + $0x10] sm:$0xff] (!%p270_p7)  ;;  %v324_v4 = vld [vmem:[%s934_s29 + $0x48] sm:$0xff] (!%p270_p7)  ;;  %v323_v7 = vld [vmem:[%s934_s29 + $0x40] sm:$0xff] (!%p270_p7) }
  0x3a   : > { %v321_v3 = vld [vmem:[%s934_s29 + $0x30] sm:$0xff]  ;;  %v328_v6 = vld [vmem:[%s934_s29 + $0x68] sm:$0xff]  ;;  %v327_v8 = vld [vmem:[%s934_s29 + $0x60] sm:$0xff]  ;;  %s1022_s5 = smov (!%p305_p8, %s643_s5), 7  ;;  %s1024_s15 = smov (!%p310_p9, %s795_s15), 1 }
  0x3b   : > { %652 = vmatprep.subr.bf16.mxu0 %v651_v60  ;;  %v681_v5 = vpack.c.bf16 %v321_v3, %v317_v2  ;;  %680 = vmatprep.subr.bf16.mxu1 %v679_v1  ;;  %v655_v9 = vpack.c.bf16 %v328_v6, %v324_v4  ;;  %v657_v10 = vpack.c.bf16 %v327_v8, %v323_v7  ;;  %v326_v11 = vld [vmem:[%s934_s29 + $0x58] sm:$0xff]  ;;  %v325_v13 = vld [vmem:[%s934_s29 + $0x50] sm:$0xff]  ;;  %v332_v16 = vld [vmem:[%s934_s29 + $0x88] sm:$0xff]  ;;  %s644_s6 = sshll.u32 %s1022_s5, 3  ;;  %s645_s10 = sshll.u32 %s1024_s15, 3 }
  0x3c   : > { %654 = vmatpush1.bf16.msra.mxu0 %v653_v0  ;;  %v330_v12 = vld [vmem:[%s934_s29 + $0x78] sm:$0xff]  ;;  %v329_v15 = vld [vmem:[%s934_s29 + $0x70] sm:$0xff]  ;;  %v336_v17 = vld [vmem:[%s934_s29 + $0xa8] sm:$0xff]  ;;  %s308_s9 = scalar_lea.vmem %s1016_s2, %s644_s6  ;;  %s313_s14 = scalar_lea.vmem %s1017_s3, %s645_s10 }
  0x3d   : > { %682 = vmatpush1.bf16.msra.mxu1 %v681_v5  ;;  %v683_v14 = vpack.c.bf16 %v330_v12, %v326_v11  ;;  %656 = vmatprep.subr.bf16.mxu0 %v655_v9  ;;  %v685_v18 = vpack.c.bf16 %v329_v15, %v325_v13  ;;  %v659_v19 = vpack.c.bf16 %v336_v17, %v332_v16  ;;  %v331_v20 = vld [vmem:[%s934_s29 + $0x80] sm:$0xff]  ;;  %v334_v22 = vld [vmem:[%s934_s29 + $0x98] sm:$0xff]  ;;  %v333_v24 = vld [vmem:[%s934_s29 + $0x90] sm:$0xff] }
  0x3e   : > { %v335_v21 = vld [vmem:[%s934_s29 + $0xa0] sm:$0xff]  ;;  %v338_v23 = vld [vmem:[%s934_s29 + $0xb8] sm:$0xff]  ;;  %v337_v25 = vld [vmem:[%s934_s29 + $0xb0] sm:$0xff] }
  0x3f   : > { %684 = vmatprep.subr.bf16.mxu1 %v683_v14  ;;  %v661_v26 = vpack.c.bf16 %v335_v21, %v331_v20  ;;  %v687_v27 = vpack.c.bf16 %v338_v23, %v334_v22  ;;  %v340_v28 = vld [vmem:[%s934_s29 + $0xc8] sm:$0xff]  ;;  %v339_v30 = vld [vmem:[%s934_s29 + $0xc0] sm:$0xff]  ;;  %v689_v31 = vpack.c.bf16 %v337_v25, %v333_v24  ;;  %v342_v34 = vld [vmem:[%s934_s29 + $0xd8] sm:$0xff] }
  0x40   : > { %658 = vmatpush1.bf16.msra.mxu0 %v657_v10  ;;  %v344_v29 = vld [vmem:[%s934_s29 + $0xe8] sm:$0xff]  ;;  %v343_v33 = vld [vmem:[%s934_s29 + $0xe0] sm:$0xff]  ;;  %v346_v35 = vld [vmem:[%s934_s29 + $0xf8] sm:$0xff] }
  0x41   : > { %686 = vmatpush1.bf16.msra.mxu1 %v685_v18  ;;  %660 = vmatprep.subr.bf16.mxu0 %v659_v19  ;;  %v663_v32 = vpack.c.bf16 %v344_v29, %v340_v28  ;;  %v691_v36 = vpack.c.bf16 %v346_v35, %v342_v34  ;;  %v341_v37 = vld [vmem:[%s934_s29 + $0xd0] sm:$0xff]  ;;  %v348_v39 = vld [vmem:[%s934_s29 + $0x108] sm:$0xff]  ;;  %v665_v41 = vpack.c.bf16 %v343_v33, %v339_v30  ;;  %v350_v42 = vld [vmem:[%s934_s29 + $0x118] sm:$0xff]  ;;  %v535_v28 = vlaneseq }
  0x42   : > { %688 = vmatprep.subr.bf16.mxu1 %v687_v27  ;;  %v345_v38 = vld [vmem:[%s934_s29 + $0xf0] sm:$0xff]  ;;  %v352_v40 = vld [vmem:[%s934_s29 + $0x128] sm:$0xff]  ;;  %v354_v43 = vld [vmem:[%s934_s29 + $0x138] sm:$0xff] }
  0x43   : > { %v693_v44 = vpack.c.bf16 %v345_v38, %v341_v37  ;;  %v667_v45 = vpack.c.bf16 %v352_v40, %v348_v39  ;;  %v347_v46 = vld [vmem:[%s934_s29 + $0x100] sm:$0xff]  ;;  %v349_v48 = vld [vmem:[%s934_s29 + $0x110] sm:$0xff]  ;;  %v695_v49 = vpack.c.bf16 %v354_v43, %v350_v42  ;;  %v356_v51 = vld [vmem:[%s934_s29 + $0x148] sm:$0xff]  ;;  %v536_v29 = vand.u32 127, %v535_v28 }
  0x44   : > { %662 = vmatpush1.bf16.msra.mxu0 %v661_v26  ;;  %v351_v47 = vld [vmem:[%s934_s29 + $0x120] sm:$0xff]  ;;  %v353_v50 = vld [vmem:[%s934_s29 + $0x130] sm:$0xff]  ;;  %v360_v52 = vld [vmem:[%s934_s29 + $0x168] sm:$0xff] }
  0x45   : > { %690 = vmatpush1.bf16.msra.mxu1 %v689_v31  ;;  %664 = vmatprep.subr.bf16.mxu0 %v663_v32  ;;  %v358_v53 = vld [vmem:[%s934_s29 + $0x158] sm:$0xff]  ;;  %v669_v55 = vpack.c.bf16 %v351_v47, %v347_v46  ;;  %v697_v56 = vpack.c.bf16 %v353_v50, %v349_v48  ;;  %v671_v57 = vpack.c.bf16 %v360_v52, %v356_v51  ;;  %v355_v58 = vld [vmem:[%s934_s29 + $0x140] sm:$0xff]  ;;  %v357_v60 = vld [vmem:[%s934_s29 + $0x150] sm:$0xff]  ;;  %vm537_vm1 = vcmp.eq.s32.totalorder %v536_v29, 0 }
  0x46   : > { %692 = vmatprep.subr.bf16.mxu1 %v691_v36  ;;  %v362_v54 = vld [vmem:[%s934_s29 + $0x178] sm:$0xff]  ;;  %v359_v59 = vld [vmem:[%s934_s29 + $0x160] sm:$0xff]  ;;  %v361_v62 = vld [vmem:[%s934_s29 + $0x170] sm:$0xff]  ;;  %vm539_vm2 = vcmp.eq.s32.totalorder %v536_v29, 1 }
  0x47   : > { %v699_v61 = vpack.c.bf16 %v362_v54, %v358_v53  ;;  %v364_v63 = vld [vmem:[%s934_s29 + $0x188] sm:$0xff]  ;;  %v366_v1 = vld [vmem:[%s934_s29 + $0x198] sm:$0xff]  ;;  %v673_v3 = vpack.c.bf16 %v359_v59, %v355_v58  ;;  %v701_v4 = vpack.c.bf16 %v361_v62, %v357_v60  ;;  %v363_v6 = vld [vmem:[%s934_s29 + $0x180] sm:$0xff] }
  0x48   : > { %666 = vmatpush1.bf16.msra.mxu0 %v665_v41  ;;  %v368_v0 = vld [vmem:[%s934_s29 + $0x1a8] sm:$0xff]  ;;  %v370_v2 = vld [vmem:[%s934_s29 + $0x1b8] sm:$0xff]  ;;  %v367_v7 = vld [vmem:[%s934_s29 + $0x1a0] sm:$0xff] }
  0x49   : > { %694 = vmatpush1.bf16.msra.mxu1 %v693_v44  ;;  %668 = vmatprep.subr.bf16.mxu0 %v667_v45  ;;  %v675_v5 = vpack.c.bf16 %v368_v0, %v364_v63  ;;  %v703_v8 = vpack.c.bf16 %v370_v2, %v366_v1  ;;  %v365_v9 = vld [vmem:[%s934_s29 + $0x190] sm:$0xff]  ;;  %v677_v11 = vpack.c.bf16 %v367_v7, %v363_v6  ;;  %v314_v13 = vld [vmem:[%s1014_s0] sm:$0xff] }
  0x4a   : > { %696 = vmatprep.subr.bf16.mxu1 %v695_v49  ;;  %v369_v10 = vld [vmem:[%s934_s29 + $0x1b0] sm:$0xff] }
  0x4b   : > { %v705_v12 = vpack.c.bf16 %v369_v10, %v365_v9 }
  0x4c   : > { %670 = vmatpush1.bf16.msra.mxu0 %v669_v55 }
  0x4d   : > { %698 = vmatpush1.bf16.msra.mxu1 %v697_v56  ;;  %672 = vmatprep.subr.bf16.mxu0 %v671_v57 }
  0x4e   : > { %700 = vmatprep.subr.bf16.mxu1 %v699_v61 }
  0x50   : > { %674 = vmatpush1.bf16.msra.mxu0 %v673_v3 }
  0x51   : > { %702 = vmatpush1.bf16.msra.mxu1 %v701_v4  ;;  %676 = vmatprep.subr.bf16.mxu0 %v675_v5 }
  0x52   : > { %704 = vmatprep.subr.bf16.mxu1 %v703_v8 }
  0x54   : > { %678 = vmatpush1.bf16.msra.mxu0 %v677_v11 }
  0x55   : > { %706 = vmatpush1.bf16.msra.mxu1 %v705_v12 }
  0x57   : > { %646 = vmatmul.mubr.msk.f32.vlgmr.msra.gmra.mrb[0].mxu0 %vm371_vm0, %v314_v13 }
  0x58   : > { %647 = vmatmul.mubr.msk.f32.vlgmr.msra.gmra.mrb[0].mxu1 %vm371_vm0, %v314_v13 }
 0x12a   : > { %v441_v14 = vpop.f32.mrb[0].mxu0 }
 0x12b   : > { %517 = vst [vmem:[%s308_s9] sm:$0xff] %v441_v14  ;;  %v526_v15 = vmul.f32 %v441_v14, %v441_v14  ;;  %v443_v16 = vpop.f32.mrb[1].mxu0  ;;  %v512_v17 = vpop.f32.mrb[0].mxu1 }
 0x12c   : > { %518 = vst [vmem:[%s308_s9 + $0x8] sm:$0xff] %v443_v16  ;;  %v521_v18 = vadd.f32 %v443_v16, %v441_v14  ;;  %v527_v19 = vmul.f32 %v443_v16, %v443_v16  ;;  %v528_v20 = vmul.f32 %v512_v17, %v512_v17  ;;  %v514_v21 = vpop.f32.mrb[1].mxu1  ;;  %519 = vst [vmem:[%s308_s9 + $0x10] sm:$0xff] %v512_v17 }
 0x12d   : > { %520 = vst [vmem:[%s308_s9 + $0x18] sm:$0xff] %v514_v21  ;;  %v529_v24 = vmul.f32 %v514_v21, %v514_v21 }
 0x12e   : > { %v530_v22 = vadd.f32 %v527_v19, %v526_v15  ;;  %v522_v23 = vadd.f32 %v521_v18, %v512_v17 }
 0x130   : > { %v523_v25 = vadd.f32 %v522_v23, %v514_v21  ;;  %v531_v26 = vadd.f32 %v530_v22, %v528_v20 }
 0x132   : > { %524 = vadd.xlane.f32.xlu0 %v523_v25  ;;  %v532_v27 = vadd.f32 %v531_v26, %v529_v24 }
 0x136   : > { %533 = vadd.xlane.f32.xlu0 %v532_v27 }
 0x1bf   : > { %v525_v30 = vpop.xlane.xlu0 %524 }
 0x1c0   : > { %v538_v32 = vsel %vm537_vm1, %v525_v30, 0.0 }
 0x1c3   : > { %v534_v31 = vpop.xlane.xlu0 %533 }
 0x1c4   : > { %v540_v33 = vsel %vm539_vm2, %v534_v31, 0.0 }
 0x1c5   : > { %v541_v34 = vadd.f32 %v540_v33, %v538_v32 }
 0x1c7   : > { %542 = vst [vmem:[%s313_s14] sm:$0xff] %v541_v34 }
 0x1c8 PF: > { %p11_p10 = scmp.ge.s32.totalorder %s798_s16, 4   ;;  %s1018_s12 = smov %s752_s13 }
 0x1c9   : > { %s1019_s13 = smov %s807_s19  ;;  %s1020_s14 = smov %s798_s16 }
 0x1ca   :  { %13 = sbr.rel (!%p11_p10) target bundleno = 2 (0x2), region = 98 }

// kernel: down_forward.8
= control target key start
LH: loop header
LB: loop body
LE: loop exit
PB: predicated region body
PF: predicated region fallthrough
CT: control target
= control target key end

     0   :  { %s982_s12 = smov 0   ;;  %s984_s13 = smov 0   ;;  %s1376_s0 = inlined_call_operand.vmem [shape: f32[8,216], index: 0, kind: input, shape index: {}]   ;;  %s1377_s1 = inlined_call_operand.vmem [shape: f32[216,1024], index: 1, kind: input, shape index: {}]   ;;  %s1378_s2 = inlined_call_operand.vmem [shape: f32[8,1024], index: 2, kind: output, shape index: {0}]   ;;  %s1379_s3 = inlined_call_operand.vmem [shape: f32[16,128], index: 3, kind: output, shape index: {1}]  }
   0x1   :  { %s986_s14 = smov 0  }
   0x2 LB: > { %s998_s15 = sadd.s32 4294967295, %s960_s14   ;;  %s1001_s16 = sadd.s32 1, %s960_s14   ;;  %s960_s14 = sphi %s986_s14, %s1382_s14   ;;  %s956_s13 = sphi %s984_s13, %s1381_s13   ;;  %s952_s12 = sphi %s982_s12, %s1380_s12  }
   0x3   : > { %s39_s17 = ssub.s32 %s960_s14, %s1001_s16  ;;  %s42_s18 = sadd.s32 1, %s956_s13 }
   0x4   : > { %p40_p0 = scmp.eq.s32.totalorder %s39_s17, 0  ;;  %p49_p1 = scmp.ne.s32.totalorder %s956_s13, %s952_s12 }
   0x5   : > { %p50_p2 = scmp.eq.s32.totalorder %s960_s14, 0  ;;  %p796_p4 = scmp.ge.s32.totalorder %s960_s14, 2 }
   0x6   : > { %s1010_s19 = scalar_select %p40_p0, %s956_s13, %s42_s18  }
   0x7   : > { %p51_p3 = por %p50_p2, %p49_p1  ;;  %130 = sbr.rel (%p796_p4) target bundleno = 73 (0x49), region = 20 }
   0xe   : > { %133 = sbr.rel (!%p51_p3) target bundleno = 73 (0x49), region = 24  ;;  %s135_s20 = sand.u32 (%p51_p3), 1, %s956_s13  }
   0xf   : > { %s807_s21 = sshll.u32 (%p51_p3), %s960_s14, 5  ;;  %s912_s22 = smul.u32 (%p51_p3), 864, %s135_s20 }
  0x10   : > { %s1018_s25 = scalar_lea.vmem (%p51_p3), %s1377_s1, %s807_s21 }
  0x11   : > { %v153_v0 = vld [vmem:[%s1018_s25] sm:$0xff] (%p51_p3)  ;;  %v155_v1 = vld [vmem:[%s1018_s25 + $0x8] sm:$0xff] (%p51_p3)  ;;  %v157_v2 = vld [vmem:[%s1018_s25 + $0x10] sm:$0xff] (%p51_p3)  ;;  %s1026_s26 = scalar_lea.vmem (%p51_p3), [#allocation2], %s912_s22 }
  0x12   : > { %v159_v3 = vld [vmem:[%s1018_s25 + $0x18] sm:$0xff] (%p51_p3)  ;;  %v161_v4 = vld [vmem:[%s1018_s25 + $0x40] sm:$0xff] (%p51_p3)  ;;  %v163_v5 = vld [vmem:[%s1018_s25 + $0x48] sm:$0xff] (%p51_p3)  ;;  %154 = vst [vmem:[%s1026_s26] sm:$0xff] (%p51_p3), %v153_v0 }
  0x13   : > { %156 = vst [vmem:[%s1026_s26 + $0x8] sm:$0xff] (%p51_p3), %v155_v1  ;;  %158 = vst [vmem:[%s1026_s26 + $0x10] sm:$0xff] (%p51_p3), %v157_v2  ;;  %v165_v6 = vld [vmem:[%s1018_s25 + $0x50] sm:$0xff] (%p51_p3)  ;;  %v167_v7 = vld [vmem:[%s1018_s25 + $0x58] sm:$0xff] (%p51_p3) }
  0x14   : > { %160 = vst [vmem:[%s1026_s26 + $0x18] sm:$0xff] (%p51_p3), %v159_v3  ;;  %162 = vst [vmem:[%s1026_s26 + $0x20] sm:$0xff] (%p51_p3), %v161_v4  ;;  %v169_v8 = vld [vmem:[%s1018_s25 + $0x80] sm:$0xff] (%p51_p3)  ;;  %v171_v9 = vld [vmem:[%s1018_s25 + $0x88] sm:$0xff] (%p51_p3) }
  0x15   : > { %164 = vst [vmem:[%s1026_s26 + $0x28] sm:$0xff] %v163_v5  ;;  %166 = vst [vmem:[%s1026_s26 + $0x30] sm:$0xff] %v165_v6  ;;  %v173_v10 = vld [vmem:[%s1018_s25 + $0x90] sm:$0xff]  ;;  %v175_v11 = vld [vmem:[%s1018_s25 + $0x98] sm:$0xff] }
  0x16   : > { %168 = vst [vmem:[%s1026_s26 + $0x38] sm:$0xff] %v167_v7  ;;  %170 = vst [vmem:[%s1026_s26 + $0x40] sm:$0xff] %v169_v8  ;;  %v177_v12 = vld [vmem:[%s1018_s25 + $0xc0] sm:$0xff]  ;;  %v179_v13 = vld [vmem:[%s1018_s25 + $0xc8] sm:$0xff] }
  0x17   : > { %172 = vst [vmem:[%s1026_s26 + $0x48] sm:$0xff] %v171_v9  ;;  %174 = vst [vmem:[%s1026_s26 + $0x50] sm:$0xff] %v173_v10  ;;  %v181_v14 = vld [vmem:[%s1018_s25 + $0xd0] sm:$0xff]  ;;  %v183_v15 = vld [vmem:[%s1018_s25 + $0xd8] sm:$0xff] }
  0x18   : > { %176 = vst [vmem:[%s1026_s26 + $0x58] sm:$0xff] %v175_v11  ;;  %178 = vst [vmem:[%s1026_s26 + $0x60] sm:$0xff] %v177_v12  ;;  %v185_v16 = vld [vmem:[%s1018_s25 + $0x100] sm:$0xff]  ;;  %v187_v17 = vld [vmem:[%s1018_s25 + $0x108] sm:$0xff] }
  0x19   : > { %180 = vst [vmem:[%s1026_s26 + $0x68] sm:$0xff] %v179_v13  ;;  %182 = vst [vmem:[%s1026_s26 + $0x70] sm:$0xff] %v181_v14  ;;  %v189_v18 = vld [vmem:[%s1018_s25 + $0x110] sm:$0xff]  ;;  %v191_v19 = vld [vmem:[%s1018_s25 + $0x118] sm:$0xff] }
  0x1a   : > { %184 = vst [vmem:[%s1026_s26 + $0x78] sm:$0xff] %v183_v15  ;;  %186 = vst [vmem:[%s1026_s26 + $0x80] sm:$0xff] %v185_v16  ;;  %v193_v20 = vld [vmem:[%s1018_s25 + $0x140] sm:$0xff]  ;;  %v195_v21 = vld [vmem:[%s1018_s25 + $0x148] sm:$0xff] }
  0x1b   : > { %188 = vst [vmem:[%s1026_s26 + $0x88] sm:$0xff] %v187_v17  ;;  %190 = vst [vmem:[%s1026_s26 + $0x90] sm:$0xff] %v189_v18  ;;  %v197_v22 = vld [vmem:[%s1018_s25 + $0x150] sm:$0xff]  ;;  %v199_v23 = vld [vmem:[%s1018_s25 + $0x158] sm:$0xff] }
  0x1c   : > { %192 = vst [vmem:[%s1026_s26 + $0x98] sm:$0xff] %v191_v19  ;;  %194 = vst [vmem:[%s1026_s26 + $0xa0] sm:$0xff] %v193_v20  ;;  %v201_v24 = vld [vmem:[%s1018_s25 + $0x180] sm:$0xff]  ;;  %v203_v25 = vld [vmem:[%s1018_s25 + $0x188] sm:$0xff] }
  0x1d   : > { %196 = vst [vmem:[%s1026_s26 + $0xa8] sm:$0xff] %v195_v21  ;;  %198 = vst [vmem:[%s1026_s26 + $0xb0] sm:$0xff] %v197_v22  ;;  %v205_v26 = vld [vmem:[%s1018_s25 + $0x190] sm:$0xff]  ;;  %v207_v27 = vld [vmem:[%s1018_s25 + $0x198] sm:$0xff] }
  0x1e   : > { %200 = vst [vmem:[%s1026_s26 + $0xb8] sm:$0xff] %v199_v23  ;;  %202 = vst [vmem:[%s1026_s26 + $0xc0] sm:$0xff] %v201_v24  ;;  %v209_v28 = vld [vmem:[%s1018_s25 + $0x1c0] sm:$0xff]  ;;  %v211_v29 = vld [vmem:[%s1018_s25 + $0x1c8] sm:$0xff] }
  0x1f   : > { %204 = vst [vmem:[%s1026_s26 + $0xc8] sm:$0xff] %v203_v25  ;;  %206 = vst [vmem:[%s1026_s26 + $0xd0] sm:$0xff] %v205_v26  ;;  %v213_v30 = vld [vmem:[%s1018_s25 + $0x1d0] sm:$0xff]  ;;  %v215_v31 = vld [vmem:[%s1018_s25 + $0x1d8] sm:$0xff] }
  0x20   : > { %208 = vst [vmem:[%s1026_s26 + $0xd8] sm:$0xff] %v207_v27  ;;  %210 = vst [vmem:[%s1026_s26 + $0xe0] sm:$0xff] %v209_v28  ;;  %v217_v32 = vld [vmem:[%s1018_s25 + $0x200] sm:$0xff]  ;;  %v219_v33 = vld [vmem:[%s1018_s25 + $0x208] sm:$0xff] }
  0x21   : > { %212 = vst [vmem:[%s1026_s26 + $0xe8] sm:$0xff] %v211_v29  ;;  %214 = vst [vmem:[%s1026_s26 + $0xf0] sm:$0xff] %v213_v30  ;;  %v221_v34 = vld [vmem:[%s1018_s25 + $0x210] sm:$0xff]  ;;  %v223_v35 = vld [vmem:[%s1018_s25 + $0x218] sm:$0xff] }
  0x22   : > { %216 = vst [vmem:[%s1026_s26 + $0xf8] sm:$0xff] %v215_v31  ;;  %218 = vst [vmem:[%s1026_s26 + $0x100] sm:$0xff] %v217_v32  ;;  %v225_v36 = vld [vmem:[%s1018_s25 + $0x240] sm:$0xff]  ;;  %v227_v37 = vld [vmem:[%s1018_s25 + $0x248] sm:$0xff] }
  0x23   : > { %220 = vst [vmem:[%s1026_s26 + $0x108] sm:$0xff] %v219_v33  ;;  %222 = vst [vmem:[%s1026_s26 + $0x110] sm:$0xff] %v221_v34  ;;  %v229_v38 = vld [vmem:[%s1018_s25 + $0x250] sm:$0xff]  ;;  %v231_v39 = vld [vmem:[%s1018_s25 + $0x258] sm:$0xff] }
  0x24   : > { %224 = vst [vmem:[%s1026_s26 + $0x118] sm:$0xff] %v223_v35  ;;  %226 = vst [vmem:[%s1026_s26 + $0x120] sm:$0xff] %v225_v36  ;;  %v233_v40 = vld [vmem:[%s1018_s25 + $0x280] sm:$0xff]  ;;  %v235_v41 = vld [vmem:[%s1018_s25 + $0x288] sm:$0xff] }
  0x25   : > { %228 = vst [vmem:[%s1026_s26 + $0x128] sm:$0xff] %v227_v37  ;;  %230 = vst [vmem:[%s1026_s26 + $0x130] sm:$0xff] %v229_v38  ;;  %v237_v42 = vld [vmem:[%s1018_s25 + $0x290] sm:$0xff]  ;;  %v239_v43 = vld [vmem:[%s1018_s25 + $0x298] sm:$0xff] }
  0x26   : > { %232 = vst [vmem:[%s1026_s26 + $0x138] sm:$0xff] %v231_v39  ;;  %234 = vst [vmem:[%s1026_s26 + $0x140] sm:$0xff] %v233_v40  ;;  %v241_v44 = vld [vmem:[%s1018_s25 + $0x2c0] sm:$0xff]  ;;  %v243_v45 = vld [vmem:[%s1018_s25 + $0x2c8] sm:$0xff] }
  0x27   : > { %236 = vst [vmem:[%s1026_s26 + $0x148] sm:$0xff] %v235_v41  ;;  %238 = vst [vmem:[%s1026_s26 + $0x150] sm:$0xff] %v237_v42  ;;  %v245_v46 = vld [vmem:[%s1018_s25 + $0x2d0] sm:$0xff]  ;;  %v247_v47 = vld [vmem:[%s1018_s25 + $0x2d8] sm:$0xff] }
  0x28   : > { %240 = vst [vmem:[%s1026_s26 + $0x158] sm:$0xff] %v239_v43  ;;  %242 = vst [vmem:[%s1026_s26 + $0x160] sm:$0xff] %v241_v44  ;;  %v249_v48 = vld [vmem:[%s1018_s25 + $0x300] sm:$0xff]  ;;  %v251_v49 = vld [vmem:[%s1018_s25 + $0x308] sm:$0xff] }
  0x29   : > { %244 = vst [vmem:[%s1026_s26 + $0x168] sm:$0xff] %v243_v45  ;;  %246 = vst [vmem:[%s1026_s26 + $0x170] sm:$0xff] %v245_v46  ;;  %v253_v50 = vld [vmem:[%s1018_s25 + $0x310] sm:$0xff]  ;;  %v255_v51 = vld [vmem:[%s1018_s25 + $0x318] sm:$0xff] }
  0x2a   : > { %248 = vst [vmem:[%s1026_s26 + $0x178] sm:$0xff] %v247_v47  ;;  %250 = vst [vmem:[%s1026_s26 + $0x180] sm:$0xff] %v249_v48  ;;  %v257_v52 = vld [vmem:[%s1018_s25 + $0x340] sm:$0xff]  ;;  %v259_v53 = vld [vmem:[%s1018_s25 + $0x348] sm:$0xff] }
  0x2b   : > { %252 = vst [vmem:[%s1026_s26 + $0x188] sm:$0xff] %v251_v49  ;;  %254 = vst [vmem:[%s1026_s26 + $0x190] sm:$0xff] %v253_v50  ;;  %v261_v54 = vld [vmem:[%s1018_s25 + $0x350] sm:$0xff]  ;;  %v263_v55 = vld [vmem:[%s1018_s25 + $0x358] sm:$0xff] }
  0x2c   : > { %256 = vst [vmem:[%s1026_s26 + $0x198] sm:$0xff] %v255_v51  ;;  %258 = vst [vmem:[%s1026_s26 + $0x1a0] sm:$0xff] %v257_v52  ;;  %v265_v56 = vld [vmem:[%s1018_s25 + $0x380] sm:$0xff]  ;;  %v267_v57 = vld [vmem:[%s1018_s25 + $0x388] sm:$0xff] }
  0x2d   : > { %260 = vst [vmem:[%s1026_s26 + $0x1a8] sm:$0xff] %v259_v53  ;;  %262 = vst [vmem:[%s1026_s26 + $0x1b0] sm:$0xff] %v261_v54  ;;  %v269_v58 = vld [vmem:[%s1018_s25 + $0x390] sm:$0xff]  ;;  %v271_v59 = vld [vmem:[%s1018_s25 + $0x398] sm:$0xff] }
  0x2e   : > { %264 = vst [vmem:[%s1026_s26 + $0x1b8] sm:$0xff] %v263_v55  ;;  %266 = vst [vmem:[%s1026_s26 + $0x1c0] sm:$0xff] %v265_v56  ;;  %v273_v60 = vld [vmem:[%s1018_s25 + $0x3c0] sm:$0xff]  ;;  %v275_v61 = vld [vmem:[%s1018_s25 + $0x3c8] sm:$0xff] }
  0x2f   : > { %268 = vst [vmem:[%s1026_s26 + $0x1c8] sm:$0xff] %v267_v57  ;;  %270 = vst [vmem:[%s1026_s26 + $0x1d0] sm:$0xff] %v269_v58  ;;  %v277_v62 = vld [vmem:[%s1018_s25 + $0x3d0] sm:$0xff]  ;;  %v279_v63 = vld [vmem:[%s1018_s25 + $0x3d8] sm:$0xff] }
  0x30   : > { %272 = vst [vmem:[%s1026_s26 + $0x1d8] sm:$0xff] %v271_v59  ;;  %274 = vst [vmem:[%s1026_s26 + $0x1e0] sm:$0xff] %v273_v60  ;;  %v281_v0 = vld [vmem:[%s1018_s25 + $0x400] sm:$0xff]  ;;  %v283_v1 = vld [vmem:[%s1018_s25 + $0x408] sm:$0xff] }
  0x31   : > { %276 = vst [vmem:[%s1026_s26 + $0x1e8] sm:$0xff] %v275_v61  ;;  %278 = vst [vmem:[%s1026_s26 + $0x1f0] sm:$0xff] %v277_v62  ;;  %v285_v2 = vld [vmem:[%s1018_s25 + $0x410] sm:$0xff]  ;;  %v287_v3 = vld [vmem:[%s1018_s25 + $0x418] sm:$0xff] }
  0x32   : > { %280 = vst [vmem:[%s1026_s26 + $0x1f8] sm:$0xff] %v279_v63  ;;  %282 = vst [vmem:[%s1026_s26 + $0x200] sm:$0xff] %v281_v0  ;;  %v289_v4 = vld [vmem:[%s1018_s25 + $0x440] sm:$0xff]  ;;  %v291_v5 = vld [vmem:[%s1018_s25 + $0x448] sm:$0xff] }
  0x33   : > { %284 = vst [vmem:[%s1026_s26 + $0x208] sm:$0xff] %v283_v1  ;;  %286 = vst [vmem:[%s1026_s26 + $0x210] sm:$0xff] %v285_v2  ;;  %v293_v6 = vld [vmem:[%s1018_s25 + $0x450] sm:$0xff]  ;;  %v295_v7 = vld [vmem:[%s1018_s25 + $0x458] sm:$0xff] }
  0x34   : > { %288 = vst [vmem:[%s1026_s26 + $0x218] sm:$0xff] %v287_v3  ;;  %290 = vst [vmem:[%s1026_s26 + $0x220] sm:$0xff] %v289_v4  ;;  %v297_v8 = vld [vmem:[%s1018_s25 + $0x480] sm:$0xff]  ;;  %v299_v9 = vld [vmem:[%s1018_s25 + $0x488] sm:$0xff] }
  0x35   : > { %292 = vst [vmem:[%s1026_s26 + $0x228] sm:$0xff] %v291_v5  ;;  %294 = vst [vmem:[%s1026_s26 + $0x230] sm:$0xff] %v293_v6  ;;  %v301_v10 = vld [vmem:[%s1018_s25 + $0x490] sm:$0xff]  ;;  %v303_v11 = vld [vmem:[%s1018_s25 + $0x498] sm:$0xff] }
  0x36   : > { %296 = vst [vmem:[%s1026_s26 + $0x238] sm:$0xff] %v295_v7  ;;  %298 = vst [vmem:[%s1026_s26 + $0x240] sm:$0xff] %v297_v8  ;;  %v305_v12 = vld [vmem:[%s1018_s25 + $0x4c0] sm:$0xff]  ;;  %v307_v13 = vld [vmem:[%s1018_s25 + $0x4c8] sm:$0xff] }
  0x37   : > { %300 = vst [vmem:[%s1026_s26 + $0x248] sm:$0xff] %v299_v9  ;;  %302 = vst [vmem:[%s1026_s26 + $0x250] sm:$0xff] %v301_v10  ;;  %v309_v14 = vld [vmem:[%s1018_s25 + $0x4d0] sm:$0xff]  ;;  %v311_v15 = vld [vmem:[%s1018_s25 + $0x4d8] sm:$0xff] }
  0x38   : > { %304 = vst [vmem:[%s1026_s26 + $0x258] sm:$0xff] %v303_v11  ;;  %306 = vst [vmem:[%s1026_s26 + $0x260] sm:$0xff] %v305_v12  ;;  %v313_v16 = vld [vmem:[%s1018_s25 + $0x500] sm:$0xff]  ;;  %v315_v17 = vld [vmem:[%s1018_s25 + $0x508] sm:$0xff] }
  0x39   : > { %308 = vst [vmem:[%s1026_s26 + $0x268] sm:$0xff] %v307_v13  ;;  %310 = vst [vmem:[%s1026_s26 + $0x270] sm:$0xff] %v309_v14  ;;  %v317_v18 = vld [vmem:[%s1018_s25 + $0x510] sm:$0xff]  ;;  %v319_v19 = vld [vmem:[%s1018_s25 + $0x518] sm:$0xff] }
  0x3a   : > { %312 = vst [vmem:[%s1026_s26 + $0x278] sm:$0xff] %v311_v15  ;;  %314 = vst [vmem:[%s1026_s26 + $0x280] sm:$0xff] %v313_v16  ;;  %v321_v20 = vld [vmem:[%s1018_s25 + $0x540] sm:$0xff]  ;;  %v323_v21 = vld [vmem:[%s1018_s25 + $0x548] sm:$0xff] }
  0x3b   : > { %316 = vst [vmem:[%s1026_s26 + $0x288] sm:$0xff] %v315_v17  ;;  %318 = vst [vmem:[%s1026_s26 + $0x290] sm:$0xff] %v317_v18  ;;  %v325_v22 = vld [vmem:[%s1018_s25 + $0x550] sm:$0xff]  ;;  %v327_v23 = vld [vmem:[%s1018_s25 + $0x558] sm:$0xff] }
  0x3c   : > { %320 = vst [vmem:[%s1026_s26 + $0x298] sm:$0xff] %v319_v19  ;;  %322 = vst [vmem:[%s1026_s26 + $0x2a0] sm:$0xff] %v321_v20  ;;  %v329_v24 = vld [vmem:[%s1018_s25 + $0x580] sm:$0xff]  ;;  %v331_v25 = vld [vmem:[%s1018_s25 + $0x588] sm:$0xff] }
  0x3d   : > { %324 = vst [vmem:[%s1026_s26 + $0x2a8] sm:$0xff] %v323_v21  ;;  %326 = vst [vmem:[%s1026_s26 + $0x2b0] sm:$0xff] %v325_v22  ;;  %v333_v26 = vld [vmem:[%s1018_s25 + $0x590] sm:$0xff]  ;;  %v335_v27 = vld [vmem:[%s1018_s25 + $0x598] sm:$0xff] }
  0x3e   : > { %328 = vst [vmem:[%s1026_s26 + $0x2b8] sm:$0xff] %v327_v23  ;;  %330 = vst [vmem:[%s1026_s26 + $0x2c0] sm:$0xff] %v329_v24  ;;  %v337_v28 = vld [vmem:[%s1018_s25 + $0x5c0] sm:$0xff]  ;;  %v339_v29 = vld [vmem:[%s1018_s25 + $0x5c8] sm:$0xff] }
  0x3f   : > { %332 = vst [vmem:[%s1026_s26 + $0x2c8] sm:$0xff] %v331_v25  ;;  %334 = vst [vmem:[%s1026_s26 + $0x2d0] sm:$0xff] %v333_v26  ;;  %v341_v30 = vld [vmem:[%s1018_s25 + $0x5d0] sm:$0xff]  ;;  %v343_v31 = vld [vmem:[%s1018_s25 + $0x5d8] sm:$0xff] }
  0x40   : > { %336 = vst [vmem:[%s1026_s26 + $0x2d8] sm:$0xff] %v335_v27  ;;  %338 = vst [vmem:[%s1026_s26 + $0x2e0] sm:$0xff] %v337_v28  ;;  %v345_v32 = vld [vmem:[%s1018_s25 + $0x600] sm:$0xff]  ;;  %v347_v33 = vld [vmem:[%s1018_s25 + $0x608] sm:$0xff] }
  0x41   : > { %340 = vst [vmem:[%s1026_s26 + $0x2e8] sm:$0xff] %v339_v29  ;;  %342 = vst [vmem:[%s1026_s26 + $0x2f0] sm:$0xff] %v341_v30  ;;  %v349_v34 = vld [vmem:[%s1018_s25 + $0x610] sm:$0xff]  ;;  %v351_v35 = vld [vmem:[%s1018_s25 + $0x618] sm:$0xff] }
  0x42   : > { %344 = vst [vmem:[%s1026_s26 + $0x2f8] sm:$0xff] %v343_v31  ;;  %346 = vst [vmem:[%s1026_s26 + $0x300] sm:$0xff] %v345_v32  ;;  %v353_v36 = vld [vmem:[%s1018_s25 + $0x640] sm:$0xff]  ;;  %v355_v37 = vld [vmem:[%s1018_s25 + $0x648] sm:$0xff] }
  0x43   : > { %348 = vst [vmem:[%s1026_s26 + $0x308] sm:$0xff] %v347_v33  ;;  %350 = vst [vmem:[%s1026_s26 + $0x310] sm:$0xff] %v349_v34  ;;  %v357_v38 = vld [vmem:[%s1018_s25 + $0x650] sm:$0xff]  ;;  %v359_v39 = vld [vmem:[%s1018_s25 + $0x658] sm:$0xff] }
  0x44   : > { %352 = vst [vmem:[%s1026_s26 + $0x318] sm:$0xff] %v351_v35  ;;  %354 = vst [vmem:[%s1026_s26 + $0x320] sm:$0xff] %v353_v36  ;;  %v361_v40 = vld [vmem:[%s1018_s25 + $0x680] sm:$0xff]  ;;  %v363_v41 = vld [vmem:[%s1018_s25 + $0x688] sm:$0xff] }
  0x45   : > { %356 = vst [vmem:[%s1026_s26 + $0x328] sm:$0xff] %v355_v37  ;;  %358 = vst [vmem:[%s1026_s26 + $0x330] sm:$0xff] %v357_v38  ;;  %v365_v42 = vld [vmem:[%s1018_s25 + $0x690] sm:$0xff]  ;;  %v367_v43 = vld [vmem:[%s1018_s25 + $0x698] sm:$0xff] }
  0x46   : > { %360 = vst [vmem:[%s1026_s26 + $0x338] sm:$0xff] %v359_v39  ;;  %362 = vst [vmem:[%s1026_s26 + $0x340] sm:$0xff] %v361_v40 }
  0x47   : > { %364 = vst [vmem:[%s1026_s26 + $0x348] sm:$0xff] %v363_v41  ;;  %366 = vst [vmem:[%s1026_s26 + $0x350] sm:$0xff] %v365_v42 }
  0x48   : > { %368 = vst [vmem:[%s1026_s26 + $0x358] sm:$0xff] %v367_v43 }
  0x49 PF: > { %p799_p5 = scmp.ge.s32.totalorder %s960_s14, 1  ;;  %p373_p6 = scmp.lt.s32.totalorder %s960_s14, 3 }
  0x4b   : > { %p374_p7 = pnand %p799_p5, %p373_p6 }
  0x4c   : > { %s380_s27 = sand.u32 (!%p374_p7), 1, %s952_s12   ;;  %v419_v44 = vld [vmem:[%s1376_s0 + $0x8] sm:$0xff] (!%p374_p7)  ;;  %vm528_vm0 = vcmask (!%p374_p7), 719872   ;;  %s800_s7 = sshll.u32 (!%p374_p7), %s998_s15, 2 }
  0x4d   : > { %377 = sbr.rel (%p374_p7) target bundleno = 508 (0x1fc), region = 47  ;;  %803 = vmatprep.mubr.msk.f32.mxu0 (!%p374_p7), %vm528_vm0, %v419_v44  ;;  %804 = vmatprep.mubr.msk.f32.mxu1 (!%p374_p7), %vm528_vm0, %v419_v44  ;;  %p409_p8 = scmp.lt.s32.totalorder (!%p374_p7), %s800_s7, 7 }
  0x4e   : > { %s913_s30 = smul.u32 (!%p374_p7), 864, %s380_s27  ;;  %p414_p9 = scmp.lt.s32.totalorder (!%p374_p7), %s998_s15, 1 }
  0x50   : > { %s1244_s4 = scalar_lea.vmem (!%p374_p7), [#allocation2], %s913_s30 }
  0x51   : > { %v421_v45 = vld [vmem:[%s1244_s4 + $0x8] sm:$0xff] (!%p374_p7)  ;;  %v420_v47 = vld [vmem:[%s1244_s4] sm:$0xff] (!%p374_p7)  ;;  %v423_v50 = vld [vmem:[%s1244_s4 + $0x18] sm:$0xff] (!%p374_p7) }
  0x52   : > { %v425_v46 = vld [vmem:[%s1244_s4 + $0x28] sm:$0xff] (!%p374_p7)  ;;  %v424_v49 = vld [vmem:[%s1244_s4 + $0x20] sm:$0xff] (!%p374_p7)  ;;  %v427_v51 = vld [vmem:[%s1244_s4 + $0x38] sm:$0xff] (!%p374_p7) }
  0x53   : > { %v808_v48 = vpack.c.bf16 (!%p374_p7), %v425_v46, %v421_v45  ;;  %v810_v52 = vpack.c.bf16 (!%p374_p7), %v424_v49, %v420_v47  ;;  %v860_v53 = vpack.c.bf16 (!%p374_p7), %v427_v51, %v423_v50  ;;  %v422_v54 = vld [vmem:[%s1244_s4 + $0x10] sm:$0xff] (!%p374_p7)  ;;  %v429_v56 = vld [vmem:[%s1244_s4 + $0x48] sm:$0xff] (!%p374_p7)  ;;  %v428_v59 = vld [vmem:[%s1244_s4 + $0x40] sm:$0xff] (!%p374_p7) }
  0x54   : > { %v426_v55 = vld [vmem:[%s1244_s4 + $0x30] sm:$0xff]  ;;  %v433_v58 = vld [vmem:[%s1244_s4 + $0x68] sm:$0xff]  ;;  %v432_v60 = vld [vmem:[%s1244_s4 + $0x60] sm:$0xff]  ;;  %s1384_s7 = smov (!%p409_p8, %s800_s7), 7  ;;  %s1386_s15 = smov (!%p414_p9, %s998_s15), 1 }
  0x55   : > { %809 = vmatprep.subr.bf16.mxu0 %v808_v48  ;;  %v862_v57 = vpack.c.bf16 %v426_v55, %v422_v54  ;;  %861 = vmatprep.subr.bf16.mxu1 %v860_v53  ;;  %v812_v61 = vpack.c.bf16 %v433_v58, %v429_v56  ;;  %v814_v62 = vpack.c.bf16 %v432_v60, %v428_v59  ;;  %v431_v63 = vld [vmem:[%s1244_s4 + $0x58] sm:$0xff]  ;;  %v430_v1 = vld [vmem:[%s1244_s4 + $0x50] sm:$0xff]  ;;  %v437_v4 = vld [vmem:[%s1244_s4 + $0x88] sm:$0xff]  ;;  %s801_s8 = sshll.u32 %s1384_s7, 3  ;;  %s802_s12 = sshll.u32 %s1386_s15, 3 }
  0x56   : > { %811 = vmatpush1.bf16.msra.mxu0 %v810_v52  ;;  %v435_v0 = vld [vmem:[%s1244_s4 + $0x78] sm:$0xff]  ;;  %v434_v3 = vld [vmem:[%s1244_s4 + $0x70] sm:$0xff]  ;;  %v441_v5 = vld [vmem:[%s1244_s4 + $0xa8] sm:$0xff]  ;;  %s412_s11 = scalar_lea.vmem %s1378_s2, %s801_s8  ;;  %s417_s18 = scalar_lea.vmem %s1379_s3, %s802_s12 }
  0x57   : > { %863 = vmatpush1.bf16.msra.mxu1 %v862_v57  ;;  %v864_v2 = vpack.c.bf16 %v435_v0, %v431_v63  ;;  %813 = vmatprep.subr.bf16.mxu0 %v812_v61  ;;  %v866_v6 = vpack.c.bf16 %v434_v3, %v430_v1  ;;  %v816_v7 = vpack.c.bf16 %v441_v5, %v437_v4  ;;  %v436_v8 = vld [vmem:[%s1244_s4 + $0x80] sm:$0xff]  ;;  %v439_v10 = vld [vmem:[%s1244_s4 + $0x98] sm:$0xff]  ;;  %v438_v12 = vld [vmem:[%s1244_s4 + $0x90] sm:$0xff] }
  0x58   : > { %v440_v9 = vld [vmem:[%s1244_s4 + $0xa0] sm:$0xff]  ;;  %v443_v11 = vld [vmem:[%s1244_s4 + $0xb8] sm:$0xff]  ;;  %v442_v13 = vld [vmem:[%s1244_s4 + $0xb0] sm:$0xff] }
  0x59   : > { %865 = vmatprep.subr.bf16.mxu1 %v864_v2  ;;  %v818_v14 = vpack.c.bf16 %v440_v9, %v436_v8  ;;  %v868_v15 = vpack.c.bf16 %v443_v11, %v439_v10  ;;  %v445_v16 = vld [vmem:[%s1244_s4 + $0xc8] sm:$0xff]  ;;  %v444_v18 = vld [vmem:[%s1244_s4 + $0xc0] sm:$0xff]  ;;  %v870_v19 = vpack.c.bf16 %v442_v13, %v438_v12  ;;  %v447_v22 = vld [vmem:[%s1244_s4 + $0xd8] sm:$0xff] }
  0x5a   : > { %815 = vmatpush1.bf16.msra.mxu0 %v814_v62  ;;  %v449_v17 = vld [vmem:[%s1244_s4 + $0xe8] sm:$0xff]  ;;  %v448_v21 = vld [vmem:[%s1244_s4 + $0xe0] sm:$0xff]  ;;  %v451_v23 = vld [vmem:[%s1244_s4 + $0xf8] sm:$0xff] }
  0x5b   : > { %867 = vmatpush1.bf16.msra.mxu1 %v866_v6  ;;  %817 = vmatprep.subr.bf16.mxu0 %v816_v7  ;;  %v820_v20 = vpack.c.bf16 %v449_v17, %v445_v16  ;;  %v872_v24 = vpack.c.bf16 %v451_v23, %v447_v22  ;;  %v446_v25 = vld [vmem:[%s1244_s4 + $0xd0] sm:$0xff]  ;;  %v453_v27 = vld [vmem:[%s1244_s4 + $0x108] sm:$0xff]  ;;  %v822_v29 = vpack.c.bf16 %v448_v21, %v444_v18  ;;  %v455_v30 = vld [vmem:[%s1244_s4 + $0x118] sm:$0xff] }
  0x5c   : > { %869 = vmatprep.subr.bf16.mxu1 %v868_v15  ;;  %v450_v26 = vld [vmem:[%s1244_s4 + $0xf0] sm:$0xff]  ;;  %v457_v28 = vld [vmem:[%s1244_s4 + $0x128] sm:$0xff]  ;;  %v459_v31 = vld [vmem:[%s1244_s4 + $0x138] sm:$0xff] }
  0x5d   : > { %v874_v32 = vpack.c.bf16 %v450_v26, %v446_v25  ;;  %v824_v33 = vpack.c.bf16 %v457_v28, %v453_v27  ;;  %v452_v34 = vld [vmem:[%s1244_s4 + $0x100] sm:$0xff]  ;;  %v454_v36 = vld [vmem:[%s1244_s4 + $0x110] sm:$0xff]  ;;  %v876_v37 = vpack.c.bf16 %v459_v31, %v455_v30  ;;  %v461_v39 = vld [vmem:[%s1244_s4 + $0x148] sm:$0xff] }
  0x5e   : > { %819 = vmatpush1.bf16.msra.mxu0 %v818_v14  ;;  %v456_v35 = vld [vmem:[%s1244_s4 + $0x120] sm:$0xff]  ;;  %v458_v38 = vld [vmem:[%s1244_s4 + $0x130] sm:$0xff]  ;;  %v465_v40 = vld [vmem:[%s1244_s4 + $0x168] sm:$0xff] }
  0x5f   : > { %871 = vmatpush1.bf16.msra.mxu1 %v870_v19  ;;  %821 = vmatprep.subr.bf16.mxu0 %v820_v20  ;;  %v463_v41 = vld [vmem:[%s1244_s4 + $0x158] sm:$0xff]  ;;  %v826_v43 = vpack.c.bf16 %v456_v35, %v452_v34  ;;  %v878_v44 = vpack.c.bf16 %v458_v38, %v454_v36  ;;  %v828_v45 = vpack.c.bf16 %v465_v40, %v461_v39  ;;  %v460_v46 = vld [vmem:[%s1244_s4 + $0x140] sm:$0xff]  ;;  %v462_v48 = vld [vmem:[%s1244_s4 + $0x150] sm:$0xff] }
  0x60   : > { %873 = vmatprep.subr.bf16.mxu1 %v872_v24  ;;  %v467_v42 = vld [vmem:[%s1244_s4 + $0x178] sm:$0xff]  ;;  %v464_v47 = vld [vmem:[%s1244_s4 + $0x160] sm:$0xff]  ;;  %v466_v50 = vld [vmem:[%s1244_s4 + $0x170] sm:$0xff] }
  0x61   : > { %v880_v49 = vpack.c.bf16 %v467_v42, %v463_v41  ;;  %v469_v51 = vld [vmem:[%s1244_s4 + $0x188] sm:$0xff]  ;;  %v471_v53 = vld [vmem:[%s1244_s4 + $0x198] sm:$0xff]  ;;  %v830_v55 = vpack.c.bf16 %v464_v47, %v460_v46  ;;  %v882_v56 = vpack.c.bf16 %v466_v50, %v462_v48  ;;  %v468_v58 = vld [vmem:[%s1244_s4 + $0x180] sm:$0xff] }
  0x62   : > { %823 = vmatpush1.bf16.msra.mxu0 %v822_v29  ;;  %v473_v52 = vld [vmem:[%s1244_s4 + $0x1a8] sm:$0xff]  ;;  %v475_v54 = vld [vmem:[%s1244_s4 + $0x1b8] sm:$0xff]  ;;  %v472_v59 = vld [vmem:[%s1244_s4 + $0x1a0] sm:$0xff] }
  0x63   : > { %875 = vmatpush1.bf16.msra.mxu1 %v874_v32  ;;  %825 = vmatprep.subr.bf16.mxu0 %v824_v33  ;;  %v832_v57 = vpack.c.bf16 %v473_v52, %v469_v51  ;;  %v470_v60 = vld [vmem:[%s1244_s4 + $0x190] sm:$0xff]  ;;  %v884_v61 = vpack.c.bf16 %v475_v54, %v471_v53  ;;  %v477_v63 = vld [vmem:[%s1244_s4 + $0x1c8] sm:$0xff]  ;;  %v479_v1 = vld [vmem:[%s1244_s4 + $0x1d8] sm:$0xff]  ;;  %v834_v3 = vpack.c.bf16 %v472_v59, %v468_v58 }
  0x64   : > { %877 = vmatprep.subr.bf16.mxu1 %v876_v37  ;;  %v474_v62 = vld [vmem:[%s1244_s4 + $0x1b0] sm:$0xff]  ;;  %v481_v0 = vld [vmem:[%s1244_s4 + $0x1e8] sm:$0xff]  ;;  %v483_v2 = vld [vmem:[%s1244_s4 + $0x1f8] sm:$0xff] }
  0x65   : > { %v886_v4 = vpack.c.bf16 %v474_v62, %v470_v60  ;;  %v836_v5 = vpack.c.bf16 %v481_v0, %v477_v63  ;;  %v476_v6 = vld [vmem:[%s1244_s4 + $0x1c0] sm:$0xff]  ;;  %v478_v8 = vld [vmem:[%s1244_s4 + $0x1d0] sm:$0xff]  ;;  %v888_v9 = vpack.c.bf16 %v483_v2, %v479_v1  ;;  %v485_v11 = vld [vmem:[%s1244_s4 + $0x208] sm:$0xff] }
  0x66   : > { %827 = vmatpush1.bf16.msra.mxu0 %v826_v43  ;;  %v480_v7 = vld [vmem:[%s1244_s4 + $0x1e0] sm:$0xff]  ;;  %v482_v10 = vld [vmem:[%s1244_s4 + $0x1f0] sm:$0xff]  ;;  %v489_v12 = vld [vmem:[%s1244_s4 + $0x228] sm:$0xff] }
  0x67   : > { %879 = vmatpush1.bf16.msra.mxu1 %v878_v44  ;;  %829 = vmatprep.subr.bf16.mxu0 %v828_v45  ;;  %v487_v13 = vld [vmem:[%s1244_s4 + $0x218] sm:$0xff]  ;;  %v838_v15 = vpack.c.bf16 %v480_v7, %v476_v6  ;;  %v890_v16 = vpack.c.bf16 %v482_v10, %v478_v8  ;;  %v840_v17 = vpack.c.bf16 %v489_v12, %v485_v11  ;;  %v484_v18 = vld [vmem:[%s1244_s4 + $0x200] sm:$0xff]  ;;  %v486_v20 = vld [vmem:[%s1244_s4 + $0x210] sm:$0xff] }
  0x68   : > { %881 = vmatprep.subr.bf16.mxu1 %v880_v49  ;;  %v491_v14 = vld [vmem:[%s1244_s4 + $0x238] sm:$0xff]  ;;  %v488_v19 = vld [vmem:[%s1244_s4 + $0x220] sm:$0xff]  ;;  %v490_v22 = vld [vmem:[%s1244_s4 + $0x230] sm:$0xff] }
  0x69   : > { %v892_v21 = vpack.c.bf16 %v491_v14, %v487_v13  ;;  %v493_v23 = vld [vmem:[%s1244_s4 + $0x248] sm:$0xff]  ;;  %v495_v25 = vld [vmem:[%s1244_s4 + $0x258] sm:$0xff]  ;;  %v842_v27 = vpack.c.bf16 %v488_v19, %v484_v18  ;;  %v894_v28 = vpack.c.bf16 %v490_v22, %v486_v20  ;;  %v492_v30 = vld [vmem:[%s1244_s4 + $0x240] sm:$0xff] }
  0x6a   : > { %831 = vmatpush1.bf16.msra.mxu0 %v830_v55  ;;  %v497_v24 = vld [vmem:[%s1244_s4 + $0x268] sm:$0xff]  ;;  %v499_v26 = vld [vmem:[%s1244_s4 + $0x278] sm:$0xff]  ;;  %v496_v31 = vld [vmem:[%s1244_s4 + $0x260] sm:$0xff] }
  0x6b   : > { %883 = vmatpush1.bf16.msra.mxu1 %v882_v56  ;;  %833 = vmatprep.subr.bf16.mxu0 %v832_v57  ;;  %v844_v29 = vpack.c.bf16 %v497_v24, %v493_v23  ;;  %v494_v32 = vld [vmem:[%s1244_s4 + $0x250] sm:$0xff]  ;;  %v896_v33 = vpack.c.bf16 %v499_v26, %v495_v25  ;;  %v501_v35 = vld [vmem:[%s1244_s4 + $0x288] sm:$0xff]  ;;  %v503_v37 = vld [vmem:[%s1244_s4 + $0x298] sm:$0xff]  ;;  %v846_v39 = vpack.c.bf16 %v496_v31, %v492_v30 }
  0x6c   : > { %885 = vmatprep.subr.bf16.mxu1 %v884_v61  ;;  %v498_v34 = vld [vmem:[%s1244_s4 + $0x270] sm:$0xff]  ;;  %v505_v36 = vld [vmem:[%s1244_s4 + $0x2a8] sm:$0xff]  ;;  %v507_v38 = vld [vmem:[%s1244_s4 + $0x2b8] sm:$0xff] }
  0x6d   : > { %v898_v40 = vpack.c.bf16 %v498_v34, %v494_v32  ;;  %v848_v41 = vpack.c.bf16 %v505_v36, %v501_v35  ;;  %v500_v42 = vld [vmem:[%s1244_s4 + $0x280] sm:$0xff]  ;;  %v502_v44 = vld [vmem:[%s1244_s4 + $0x290] sm:$0xff]  ;;  %v900_v45 = vpack.c.bf16 %v507_v38, %v503_v37  ;;  %v509_v47 = vld [vmem:[%s1244_s4 + $0x2c8] sm:$0xff] }
  0x6e   : > { %835 = vmatpush1.bf16.msra.mxu0 %v834_v3  ;;  %v504_v43 = vld [vmem:[%s1244_s4 + $0x2a0] sm:$0xff]  ;;  %v506_v46 = vld [vmem:[%s1244_s4 + $0x2b0] sm:$0xff]  ;;  %v513_v48 = vld [vmem:[%s1244_s4 + $0x2e8] sm:$0xff] }
  0x6f   : > { %887 = vmatpush1.bf16.msra.mxu1 %v886_v4  ;;  %837 = vmatprep.subr.bf16.mxu0 %v836_v5  ;;  %v511_v49 = vld [vmem:[%s1244_s4 + $0x2d8] sm:$0xff]  ;;  %v850_v51 = vpack.c.bf16 %v504_v43, %v500_v42  ;;  %v902_v52 = vpack.c.bf16 %v506_v46, %v502_v44  ;;  %v852_v53 = vpack.c.bf16 %v513_v48, %v509_v47  ;;  %v508_v54 = vld [vmem:[%s1244_s4 + $0x2c0] sm:$0xff]  ;;  %v510_v56 = vld [vmem:[%s1244_s4 + $0x2d0] sm:$0xff] }
  0x70   : > { %889 = vmatprep.subr.bf16.mxu1 %v888_v9  ;;  %v515_v50 = vld [vmem:[%s1244_s4 + $0x2f8] sm:$0xff]  ;;  %v512_v55 = vld [vmem:[%s1244_s4 + $0x2e0] sm:$0xff]  ;;  %v514_v58 = vld [vmem:[%s1244_s4 + $0x2f0] sm:$0xff] }
  0x71   : > { %v904_v57 = vpack.c.bf16 %v515_v50, %v511_v49  ;;  %v517_v59 = vld [vmem:[%s1244_s4 + $0x308] sm:$0xff]  ;;  %v519_v61 = vld [vmem:[%s1244_s4 + $0x318] sm:$0xff]  ;;  %v854_v63 = vpack.c.bf16 %v512_v55, %v508_v54  ;;  %v906_v0 = vpack.c.bf16 %v514_v58, %v510_v56  ;;  %v516_v2 = vld [vmem:[%s1244_s4 + $0x300] sm:$0xff] }
  0x72   : > { %839 = vmatpush1.bf16.msra.mxu0 %v838_v15  ;;  %v521_v60 = vld [vmem:[%s1244_s4 + $0x328] sm:$0xff]  ;;  %v523_v62 = vld [vmem:[%s1244_s4 + $0x338] sm:$0xff]  ;;  %v520_v3 = vld [vmem:[%s1244_s4 + $0x320] sm:$0xff] }
  0x73   : > { %891 = vmatpush1.bf16.msra.mxu1 %v890_v16  ;;  %841 = vmatprep.subr.bf16.mxu0 %v840_v17  ;;  %v856_v1 = vpack.c.bf16 %v521_v60, %v517_v59  ;;  %v908_v4 = vpack.c.bf16 %v523_v62, %v519_v61  ;;  %v518_v5 = vld [vmem:[%s1244_s4 + $0x310] sm:$0xff]  ;;  %v858_v7 = vpack.c.bf16 %v520_v3, %v516_v2  ;;  %v525_v9 = vld [vmem:[%s1244_s4 + $0x348] sm:$0xff]  ;;  %v527_v10 = vld [vmem:[%s1244_s4 + $0x358] sm:$0xff] }
  0x74   : > { %893 = vmatprep.subr.bf16.mxu1 %v892_v21  ;;  %v522_v6 = vld [vmem:[%s1244_s4 + $0x330] sm:$0xff]  ;;  %v524_v11 = vld [vmem:[%s1244_s4 + $0x340] sm:$0xff] }
  0x75   : > { %v910_v8 = vpack.c.bf16 %v522_v6, %v518_v5  ;;  %v418_v12 = vld [vmem:[%s1376_s0] sm:$0xff]  ;;  %v526_v13 = vld [vmem:[%s1244_s4 + $0x350] sm:$0xff] }
  0x76   : > { %843 = vmatpush1.bf16.msra.mxu0 %v842_v27 }
  0x77   : > { %895 = vmatpush1.bf16.msra.mxu1 %v894_v28  ;;  %845 = vmatprep.subr.bf16.mxu0 %v844_v29  ;;  %v692_v28 = vlaneseq }
  0x78   : > { %897 = vmatprep.subr.bf16.mxu1 %v896_v33 }
  0x79   : > { %v693_v29 = vand.u32 127, %v692_v28 }
  0x7a   : > { %847 = vmatpush1.bf16.msra.mxu0 %v846_v39 }
  0x7b   : > { %899 = vmatpush1.bf16.msra.mxu1 %v898_v40  ;;  %849 = vmatprep.subr.bf16.mxu0 %v848_v41  ;;  %vm694_vm1 = vcmp.eq.s32.totalorder %v693_v29, 0  ;;  %vm696_vm2 = vcmp.eq.s32.totalorder %v693_v29, 1 }
  0x7c   : > { %901 = vmatprep.subr.bf16.mxu1 %v900_v45 }
  0x7e   : > { %851 = vmatpush1.bf16.msra.mxu0 %v850_v51 }
  0x7f   : > { %903 = vmatpush1.bf16.msra.mxu1 %v902_v52  ;;  %853 = vmatprep.subr.bf16.mxu0 %v852_v53 }
  0x80   : > { %905 = vmatprep.subr.bf16.mxu1 %v904_v57 }
  0x82   : > { %855 = vmatpush1.bf16.msra.mxu0 %v854_v63 }
  0x83   : > { %907 = vmatpush1.bf16.msra.mxu1 %v906_v0  ;;  %857 = vmatprep.subr.bf16.mxu0 %v856_v1 }
  0x84   : > { %909 = vmatprep.subr.bf16.mxu1 %v908_v4 }
  0x86   : > { %859 = vmatpush1.bf16.msra.mxu0 %v858_v7 }
  0x87   : > { %911 = vmatpush1.bf16.msra.mxu1 %v910_v8  ;;  %584 = vmatprep.subr.mxu0 %v525_v9 }
  0x88   : > { %655 = vmatprep.subr.mxu1 %v527_v10 }
  0x8a   : > { %585 = vmatpush1.msra.mxu0 %v524_v11 }
  0x8b   : > { %597 = vmatmul.mubr.f32.vlgmr.msra.gmra.mrb[0].mxu0 %v418_v12  ;;  %656 = vmatpush1.msra.mxu1 %v526_v13 }
  0x8c   : > { %668 = vmatmul.mubr.f32.vlgmr.msra.gmra.mrb[0].mxu1 %v418_v12 }
 0x15e   : > { %v598_v14 = vpop.f32.mrb[0].mxu0 }
 0x15f   : > { %674 = vst [vmem:[%s412_s11] sm:$0xff] %v598_v14  ;;  %v683_v15 = vmul.f32 %v598_v14, %v598_v14  ;;  %v600_v16 = vpop.f32.mrb[1].mxu0  ;;  %v669_v17 = vpop.f32.mrb[0].mxu1 }
 0x160   : > { %675 = vst [vmem:[%s412_s11 + $0x8] sm:$0xff] %v600_v16  ;;  %v678_v18 = vadd.f32 %v600_v16, %v598_v14  ;;  %v684_v19 = vmul.f32 %v600_v16, %v600_v16  ;;  %v685_v20 = vmul.f32 %v669_v17, %v669_v17  ;;  %v671_v21 = vpop.f32.mrb[1].mxu1  ;;  %676 = vst [vmem:[%s412_s11 + $0x10] sm:$0xff] %v669_v17 }
 0x161   : > { %677 = vst [vmem:[%s412_s11 + $0x18] sm:$0xff] %v671_v21  ;;  %v686_v24 = vmul.f32 %v671_v21, %v671_v21 }
 0x162   : > { %v687_v22 = vadd.f32 %v684_v19, %v683_v15  ;;  %v679_v23 = vadd.f32 %v678_v18, %v669_v17 }
 0x164   : > { %v680_v25 = vadd.f32 %v679_v23, %v671_v21  ;;  %v688_v26 = vadd.f32 %v687_v22, %v685_v20 }
 0x166   : > { %681 = vadd.xlane.f32.xlu0 %v680_v25  ;;  %v689_v27 = vadd.f32 %v688_v26, %v686_v24 }
 0x16a   : > { %690 = vadd.xlane.f32.xlu0 %v689_v27 }
 0x1f3   : > { %v682_v30 = vpop.xlane.xlu0 %681 }
 0x1f4   : > { %v695_v32 = vsel %vm694_vm1, %v682_v30, 0.0 }
 0x1f7   : > { %v691_v31 = vpop.xlane.xlu0 %690 }
 0x1f8   : > { %v697_v33 = vsel %vm696_vm2, %v691_v31, 0.0 }
 0x1f9   : > { %v698_v34 = vadd.f32 %v697_v33, %v695_v32 }
 0x1fb   : > { %699 = vst [vmem:[%s417_s18] sm:$0xff] %v698_v34 }
 0x1fc PF: > { %p11_p10 = scmp.ge.s32.totalorder %s1001_s16, 4   ;;  %s1380_s12 = smov %s956_s13 }
 0x1fd   : > { %s1381_s13 = smov %s1010_s19  ;;  %s1382_s14 = smov %s1001_s16 }
 0x1fe   :  { %13 = sbr.rel (!%p11_p10) target bundleno = 2 (0x2), region = 98 }

</bundles_post_ra>
